<compile_context>
chip_gen: v5e
topology: v5e:2x2
jax: 0.10.0
libtpu: 0.0.40
codegen_flags: <defaults>
</compile_context>

<pallas_src>
import jax
import jax.numpy as jnp
from jax import lax
from jax.experimental import pallas as pl
from jax.experimental.pallas import tpu as pltpu

# Architecture constants fixed by the PyTorch module (fc1 = Linear(64 * 187, 128)):
L_IN = 376                     # (L_IN - 2) // 2 == 187
KSIZE = 3
C_CONV = 64
L_CONV = L_IN - KSIZE + 1      # 374
L_POOL = L_CONV // 2           # 187
L_HALF = L_IN // 2             # 188 (even / odd half length)
FC1_IN = C_CONV * L_POOL       # 11968
FC1_OUT = 128
NUM_CLASSES = 5
LOGITS_PAD = 128               # lane-dense padded logits width
C_BLK = 8                      # conv channels processed per (innermost) grid step


def _round_up(n, m):
    return ((n + m - 1) // m) * m


def _pick_tile_b(batch):
    """Batch tile: large (<=256) for throughput, but >= 2 grid steps when possible
    so the 'parallel' batch axis can be split across v7x's two TensorCores."""
    if batch <= 8:
        return 8
    tb = _round_up(-(-batch // 2), 8)      # ceil(batch/2), rounded up to 8
    return min(tb, 256)


def cnn_fused_kernel(xe_ref, xo_ref, wc_ref, bc_ref, w1_ref, b1_ref, w2_ref,
                     b2_ref, out_ref, acc_ref):
    """One (batch-tile, channel-block) step of the fused CNN forward.

    Grid = (batch tiles ["parallel"], channel blocks ["arbitrary", innermost]).

    xe/xo: (TB, 188)         even / odd samples of the signal: x[2m], x[2m+1]
    wc:    (C_BLK, 1, 3)     conv weight slice, bc: (C_BLK, 1, 1) conv bias slice
    w1:    (C_BLK, 187, 128) bf16 fc1 weight slice (channel, length, out)
    b1:    (1, 128); w2: (128, 128) zero-padded; b2: (1, 128) zero-padded
    out:   (TB, 128)         padded logits (lane-dense, written on last channel step)
    acc:   (TB, 128) f32     fc1 pre-activation accumulator (VMEM scratch)
    """
    c = pl.program_id(1)
    nc = pl.num_programs(1)

    xe = xe_ref[...]                        # (TB, 188)
    xo = xo_ref[...]                        # (TB, 188)

    # Conv taps for the two positions inside each pooling window:
    #   conv@2m   uses x[2m],   x[2m+1], x[2m+2]
    #   conv@2m+1 uses x[2m+1], x[2m+2], x[2m+3]
    xe0 = xe[:, 0:L_POOL][None]             # (1, TB, 187)  x[2m]
    xe1 = xo[:, 0:L_POOL][None]             #               x[2m+1]
    xe2 = xe[:, 1:L_POOL + 1][None]         #               x[2m+2]
    xo2 = xo[:, 1:L_POOL + 1][None]         #               x[2m+3]

    wc = wc_ref[...]                        # (C_BLK, 1, 3)
    k0 = wc[:, :, 0:1]                      # (C_BLK, 1, 1)
    k1 = wc[:, :, 1:2]
    k2 = wc[:, :, 2:3]
    bc = bc_ref[...]                        # (C_BLK, 1, 1)

    conv_even = k0 * xe0 + k1 * xe1 + k2 * xe2 + bc     # (C_BLK, TB, 187)
    conv_odd = k0 * xe1 + k1 * xe2 + k2 * xo2 + bc      # (C_BLK, TB, 187)
    # maxpool(relu(conv)) == relu(max(conv@2m, conv@2m+1)) since relu is monotonic.
    pooled = jnp.maximum(jnp.maximum(conv_even, conv_odd), 0.0)
    pooled = pooled.astype(jnp.bfloat16)                # MXU-native feed for fc1

    # Partial fc1 for this channel block: batched matmul 'cbl,clk->cbk' with f32
    # accumulation on the MXU, then a tiny C_BLK-way reduce -> (TB, 128).
    hc = lax.dot_general(
        pooled, w1_ref[...],
        dimension_numbers=(((2,), (1,)), ((0,), (0,))),
        preferred_element_type=jnp.float32)             # (C_BLK, TB, 128)
    partial = jnp.sum(hc, axis=0)                       # (TB, 128)

    @pl.when(c == 0)
    def _():
        acc_ref[...] = jnp.zeros_like(acc_ref)

    acc_ref[...] += partial

    @pl.when(c == nc - 1)
    def _():
        h = jnp.maximum(acc_ref[...] + b1_ref[...], 0.0)            # (TB, 128)
        out = jnp.dot(h, w2_ref[...],
                      preferred_element_type=jnp.float32) + b2_ref[...]
        out_ref[...] = out.astype(out_ref.dtype)


def prepare_kernel_params(params):
    """PyTorch-layout params -> kernel-layout params (host-side, done once)."""
    w_conv, b_conv, w_fc1, b_fc1, w_fc2, b_fc2 = params
    num_classes = w_fc2.shape[0]
    wc = w_conv.reshape(C_CONV, 1, KSIZE).astype(jnp.float32)
    bc = b_conv.reshape(C_CONV, 1, 1).astype(jnp.float32)
    # torch.flatten order is index = c*187 + l, so W1^T reshaped to (64, 187, 128)
    # satisfies w1r[c, l, k] == w_fc1[k, c*187 + l].
    w1r = w_fc1.T.reshape(C_CONV, L_POOL, FC1_OUT).astype(jnp.bfloat16)
    b1 = b_fc1.reshape(1, FC1_OUT).astype(jnp.float32)
    w2p = jnp.zeros((FC1_OUT, LOGITS_PAD), jnp.float32).at[:, :num_classes].set(w_fc2.T)
    b2p = jnp.zeros((1, LOGITS_PAD), jnp.float32).at[:, :num_classes].set(b_fc2[None, :])
    return (wc, bc, w1r, b1, w2p, b2p)


def cnn_forward(x, kparams, num_classes, tile_b=None, c_blk=C_BLK):
    wc, bc, w1r, b1, w2p, b2p = kparams
    assert x.shape[1] == L_IN, f"expected input length {L_IN}, got {x.shape[1]}"
    assert C_CONV % c_blk == 0

    B = x.shape[0]
    if tile_b is None:
        tile_b = _pick_tile_b(B)
    tile_b = _round_up(tile_b, 8)
    b_pad = _round_up(B, tile_b)
    if b_pad != B:
        x = jnp.pad(x, ((0, b_pad - B), (0, 0)))

    # Host glue: even/odd de-interleave of the raw signal (stride-2 pooling taps);
    # everything else happens inside the single fused kernel.
    x_even = x[:, 0::2]                     # (b_pad, 188): x[2m]
    x_odd = x[:, 1::2]                      # (b_pad, 188): x[2m+1]

    n_cblk = C_CONV // c_blk
    const2 = lambda i, c: (0, 0)
    logits_padded = pl.pallas_call(
        cnn_fused_kernel,
        out_shape=jax.ShapeDtypeStruct((b_pad, LOGITS_PAD), jnp.float32),
        grid_spec=pltpu.PrefetchScalarGridSpec(
            num_scalar_prefetch=0,
            grid=(b_pad // tile_b, n_cblk),
            in_specs=[
                pl.BlockSpec((tile_b, L_HALF), lambda i, c: (i, 0)),      # x_even
                pl.BlockSpec((tile_b, L_HALF), lambda i, c: (i, 0)),      # x_odd
                pl.BlockSpec((c_blk, 1, KSIZE), lambda i, c: (c, 0, 0)),  # conv weight
                pl.BlockSpec((c_blk, 1, 1), lambda i, c: (c, 0, 0)),      # conv bias
                pl.BlockSpec((c_blk, L_POOL, FC1_OUT),
                             lambda i, c: (c, 0, 0)),                     # fc1 weight (bf16)
                pl.BlockSpec((1, FC1_OUT), const2),                       # fc1 bias
                pl.BlockSpec((FC1_OUT, LOGITS_PAD), const2),              # fc2 weight (padded)
                pl.BlockSpec((1, LOGITS_PAD), const2),                    # fc2 bias (padded)
            ],
            out_specs=pl.BlockSpec((tile_b, LOGITS_PAD), lambda i, c: (i, 0)),
            scratch_shapes=[pltpu.VMEM((tile_b, FC1_OUT), jnp.float32)],  # fc1 acc
        ),
        compiler_params=pltpu.CompilerParams(
            dimension_semantics=("parallel", "arbitrary"),
            vmem_limit_bytes=48 << 20,      # safe on v5e/v6e/v7x; usage is ~12 MiB
        ),
    )(x_even, x_odd, wc, bc, w1r, b1, w2p, b2p)

    return logits_padded[:B, :num_classes]


# ----------------------------- references -----------------------------------

def _pooled_reference(x, w_conv, b_conv):
    B = x.shape[0]
    w = w_conv[:, 0, :]                                            # (64, 3)
    conv = (w[None, :, 0:1] * x[:, None, 0:L_CONV]
            + w[None, :, 1:2] * x[:, None, 1:L_CONV + 1]
            + w[None, :, 2:3] * x[:, None, 2:L_CONV + 2]
            + b_conv[None, :, None])                               # (B, 64, 374)
    conv = jnp.maximum(conv, 0.0)
    return jnp.max(conv.reshape(B, C_CONV, L_POOL, 2), axis=-1)    # (B, 64, 187)


def reference_forward(x, params):
    """Pure-JAX f32 reference mirroring the PyTorch forward pass."""
    w_conv, b_conv, w_fc1, b_fc1, w_fc2, b_fc2 = params
    feat = _pooled_reference(x, w_conv, b_conv).reshape(x.shape[0], FC1_IN)
    h = jnp.maximum(
        jnp.dot(feat, w_fc1.T, precision=lax.Precision.HIGHEST) + b_fc1, 0.0)
    return jnp.dot(h, w_fc2.T, precision=lax.Precision.HIGHEST) + b_fc2


def reference_forward_bf16(x, params):
    """Reference applying the same bf16 fc1 quantization as the kernel."""
    w_conv, b_conv, w_fc1, b_fc1, w_fc2, b_fc2 = params
    feat = _pooled_reference(x, w_conv, b_conv).reshape(x.shape[0], FC1_IN)
    h = jnp.dot(feat.astype(jnp.bfloat16), w_fc1.T.astype(jnp.bfloat16),
                preferred_element_type=jnp.float32) + b_fc1
    h = jnp.maximum(h, 0.0)
    return jnp.dot(h, w_fc2.T, precision=lax.Precision.HIGHEST) + b_fc2


def init_params(key, num_classes):
    """Random params in PyTorch layout: conv1 (64,1,3)/(64,), fc1 (128,11968)/(128,), fc2 (C,128)/(C,)."""
    ks = jax.random.split(key, 6)
    w_conv = jax.random.normal(ks[0], (C_CONV, 1, KSIZE), jnp.float32) / jnp.sqrt(3.0)
    b_conv = jax.random.normal(ks[1], (C_CONV,), jnp.float32) * 0.1
    w_fc1 = jax.random.normal(ks[2], (FC1_OUT, FC1_IN), jnp.float32) / jnp.sqrt(float(FC1_IN))
    b_fc1 = jax.random.normal(ks[3], (FC1_OUT,), jnp.float32) * 0.1
    w_fc2 = jax.random.normal(ks[4], (num_classes, FC1_OUT), jnp.float32) / jnp.sqrt(float(FC1_OUT))
    b_fc2 = jax.random.normal(ks[5], (num_classes,), jnp.float32) * 0.1
    return (w_conv, b_conv, w_fc1, b_fc1, w_fc2, b_fc2)


if __name__ == "__main__":
    key = jax.random.PRNGKey(0)
    pkey, xkey = jax.random.split(key)
    params = init_params(pkey, NUM_CLASSES)
    kparams = prepare_kernel_params(params)

    B = 16
    x = jax.random.normal(xkey, (B, L_IN), jnp.float32)

    fwd = jax.jit(cnn_forward, static_argnames=("num_classes", "tile_b", "c_blk"))
    out = jax.block_until_ready(fwd(x, kparams, num_classes=NUM_CLASSES))
    assert out.shape == (B, NUM_CLASSES), out.shape

    ref_bf16 = reference_forward_bf16(x, params)   # same bf16 fc1 quantization
    ref_f32 = reference_forward(x, params)         # PyTorch-semantics f32
    if not bool(jnp.allclose(out, ref_bf16, rtol=1e-2, atol=1e-2)):
        raise AssertionError("Pallas CNN output does not match bf16-quantized reference")
    if not bool(jnp.allclose(out, ref_f32, rtol=5e-2, atol=5e-2)):
        raise AssertionError("Pallas CNN output drifted too far from f32 reference")
    print("KERNEL_OK")
</pallas_src>

<mosaic_0001>
module attributes {stable_mosaic.version = 11 : i64} {
  func.func @cnn_fused_kernel(%arg0: i32, %arg1: i32, %arg2: memref<8x188xf32, #tpu.memory_space<vmem>>, %arg3: memref<8x188xf32, #tpu.memory_space<vmem>>, %arg4: memref<8x1x3xf32, #tpu.memory_space<vmem>>, %arg5: memref<8x1x1xf32, #tpu.memory_space<vmem>>, %arg6: memref<8x187x128xbf16, #tpu.memory_space<vmem>>, %arg7: memref<1x128xf32, #tpu.memory_space<vmem>>, %arg8: memref<128x128xf32, #tpu.memory_space<vmem>>, %arg9: memref<1x128xf32, #tpu.memory_space<vmem>>, %arg10: memref<8x128xf32, #tpu.memory_space<vmem>>, %arg11: memref<8x128xf32, #tpu.memory_space<vmem>>) attributes {dimension_semantics = [#tpu.dimension_semantics<parallel>, #tpu.dimension_semantics<arbitrary>], iteration_bounds = array<i64: 2, 8>, scalar_prefetch = 0 : i64, scratch_operands = 1 : i64, tpu.core_type = #tpu.core_type<tc>, window_params = [{transform_indices = @transform_0, window_bounds = array<i64: 8, 188>}, {transform_indices = @transform_1, window_bounds = array<i64: 8, 188>}, {transform_indices = @transform_2, window_bounds = array<i64: 8, 1, 3>}, {transform_indices = @transform_3, window_bounds = array<i64: 8, 1, 1>}, {transform_indices = @transform_4, window_bounds = array<i64: 8, 187, 128>}, {pipeline_mode = #tpu.pipeline_mode<synchronous>, transform_indices = @transform_5, window_bounds = array<i64: 1, 128>}, {pipeline_mode = #tpu.pipeline_mode<synchronous>, transform_indices = @transform_6, window_bounds = array<i64: 128, 128>}, {pipeline_mode = #tpu.pipeline_mode<synchronous>, transform_indices = @transform_7, window_bounds = array<i64: 1, 128>}, {transform_indices = @transform_8, window_bounds = array<i64: 8, 128>}]} {
    %c0 = arith.constant 0 : index
    %c0_0 = arith.constant 0 : index
    %0 = vector.load %arg2[%c0, %c0_0] : memref<8x188xf32, #tpu.memory_space<vmem>>, vector<8x188xf32>
    %c0_1 = arith.constant 0 : index
    %c0_2 = arith.constant 0 : index
    %1 = vector.load %arg3[%c0_1, %c0_2] : memref<8x188xf32, #tpu.memory_space<vmem>>, vector<8x188xf32>
    %2 = vector.extract_strided_slice %0 {offsets = [0, 0], sizes = [8, 187], strides = [1, 1]} : vector<8x188xf32> to vector<8x187xf32>
    %3 = vector.shape_cast %2 : vector<8x187xf32> to vector<1x8x187xf32>
    %4 = vector.extract_strided_slice %1 {offsets = [0, 0], sizes = [8, 187], strides = [1, 1]} : vector<8x188xf32> to vector<8x187xf32>
    %5 = vector.shape_cast %4 : vector<8x187xf32> to vector<1x8x187xf32>
    %6 = vector.extract_strided_slice %0 {offsets = [0, 1], sizes = [8, 187], strides = [1, 1]} : vector<8x188xf32> to vector<8x187xf32>
    %7 = vector.shape_cast %6 : vector<8x187xf32> to vector<1x8x187xf32>
    %8 = vector.extract_strided_slice %1 {offsets = [0, 1], sizes = [8, 187], strides = [1, 1]} : vector<8x188xf32> to vector<8x187xf32>
    %9 = vector.shape_cast %8 : vector<8x187xf32> to vector<1x8x187xf32>
    %c0_3 = arith.constant 0 : index
    %c0_4 = arith.constant 0 : index
    %c0_5 = arith.constant 0 : index
    %10 = vector.load %arg4[%c0_3, %c0_4, %c0_5] : memref<8x1x3xf32, #tpu.memory_space<vmem>>, vector<8x1x3xf32>
    %11 = vector.extract_strided_slice %10 {offsets = [0, 0, 0], sizes = [8, 1, 1], strides = [1, 1, 1]} : vector<8x1x3xf32> to vector<8x1x1xf32>
    %12 = vector.extract_strided_slice %10 {offsets = [0, 0, 1], sizes = [8, 1, 1], strides = [1, 1, 1]} : vector<8x1x3xf32> to vector<8x1x1xf32>
    %13 = vector.extract_strided_slice %10 {offsets = [0, 0, 2], sizes = [8, 1, 1], strides = [1, 1, 1]} : vector<8x1x3xf32> to vector<8x1x1xf32>
    %c0_6 = arith.constant 0 : index
    %c0_7 = arith.constant 0 : index
    %c0_8 = arith.constant 0 : index
    %14 = vector.load %arg5[%c0_6, %c0_7, %c0_8] : memref<8x1x1xf32, #tpu.memory_space<vmem>>, vector<8x1x1xf32>
    %15 = vector.broadcast %11 : vector<8x1x1xf32> to vector<8x8x187xf32>
    %16 = vector.broadcast %3 : vector<1x8x187xf32> to vector<8x8x187xf32>
    %17 = arith.mulf %15, %16 : vector<8x8x187xf32>
    %18 = vector.broadcast %12 : vector<8x1x1xf32> to vector<8x8x187xf32>
    %19 = vector.broadcast %5 : vector<1x8x187xf32> to vector<8x8x187xf32>
    %20 = arith.mulf %18, %19 : vector<8x8x187xf32>
    %21 = arith.addf %17, %20 : vector<8x8x187xf32>
    %22 = vector.broadcast %13 : vector<8x1x1xf32> to vector<8x8x187xf32>
    %23 = vector.broadcast %7 : vector<1x8x187xf32> to vector<8x8x187xf32>
    %24 = arith.mulf %22, %23 : vector<8x8x187xf32>
    %25 = arith.addf %21, %24 : vector<8x8x187xf32>
    %26 = vector.broadcast %14 : vector<8x1x1xf32> to vector<8x8x187xf32>
    %27 = arith.addf %25, %26 : vector<8x8x187xf32>
    %28 = vector.broadcast %11 : vector<8x1x1xf32> to vector<8x8x187xf32>
    %29 = vector.broadcast %5 : vector<1x8x187xf32> to vector<8x8x187xf32>
    %30 = arith.mulf %28, %29 : vector<8x8x187xf32>
    %31 = vector.broadcast %12 : vector<8x1x1xf32> to vector<8x8x187xf32>
    %32 = vector.broadcast %7 : vector<1x8x187xf32> to vector<8x8x187xf32>
    %33 = arith.mulf %31, %32 : vector<8x8x187xf32>
    %34 = arith.addf %30, %33 : vector<8x8x187xf32>
    %35 = vector.broadcast %13 : vector<8x1x1xf32> to vector<8x8x187xf32>
    %36 = vector.broadcast %9 : vector<1x8x187xf32> to vector<8x8x187xf32>
    %37 = arith.mulf %35, %36 : vector<8x8x187xf32>
    %38 = arith.addf %34, %37 : vector<8x8x187xf32>
    %39 = vector.broadcast %14 : vector<8x1x1xf32> to vector<8x8x187xf32>
    %40 = arith.addf %38, %39 : vector<8x8x187xf32>
    %41 = arith.maximumf %27, %40 : vector<8x8x187xf32>
    %cst = arith.constant 0.000000e+00 : f32
    %42 = vector.broadcast %cst : f32 to vector<8x8x187xf32>
    %43 = arith.maximumf %41, %42 : vector<8x8x187xf32>
    %44 = arith.truncf %43 : vector<8x8x187xf32> to vector<8x8x187xbf16>
    %c0_9 = arith.constant 0 : index
    %c0_10 = arith.constant 0 : index
    %c0_11 = arith.constant 0 : index
    %45 = vector.load %arg6[%c0_9, %c0_10, %c0_11] : memref<8x187x128xbf16, #tpu.memory_space<vmem>>, vector<8x187x128xbf16>
    %cst_12 = arith.constant dense<0.000000e+00> : vector<8x8x128xf32>
    %46 = tpu.matmul %44, %45, %cst_12 {dimension_numbers = #tpu.dot_dimension_numbers<[2], [1], [1], [2], [0, 0, 0, 1, 1, 2], [0], [0]>} : vector<8x8x187xbf16>, vector<8x187x128xbf16>, vector<8x8x128xf32> -> vector<8x8x128xf32>
    %cst_13 = arith.constant dense<0.000000e+00> : vector<8x128xf32>
    %47 = vector.multi_reduction <add>, %46, %cst_13 [0] : vector<8x8x128xf32> to vector<8x128xf32>
    %c0_i32 = arith.constant 0 : i32
    %48 = arith.cmpi eq, %arg1, %c0_i32 : i32
    %49 = arith.extui %48 : i1 to i32
    %c0_i32_14 = arith.constant 0 : i32
    %50 = arith.cmpi ne, %49, %c0_i32_14 : i32
    scf.if %50 {
      %cst_20 = arith.constant 0.000000e+00 : f32
      %57 = vector.broadcast %cst_20 : f32 to vector<8x128xf32>
      %c0_21 = arith.constant 0 : index
      %c0_22 = arith.constant 0 : index
      %58 = vector.load %arg11[%c0_21, %c0_22] : memref<8x128xf32, #tpu.memory_space<vmem>>, vector<8x128xf32>
      tpu.vector_store %arg11[%c0_21, %c0_22], %57 {strides = array<i32>} : memref<8x128xf32, #tpu.memory_space<vmem>>, vector<8x128xf32>,
    } else {
    }
    %c0_15 = arith.constant 0 : index
    %c0_16 = arith.constant 0 : index
    %51 = vector.load %arg11[%c0_15, %c0_16] : memref<8x128xf32, #tpu.memory_space<vmem>>, vector<8x128xf32>
    %52 = arith.addf %51, %47 : vector<8x128xf32>
    %c0_17 = arith.constant 0 : index
    %c0_18 = arith.constant 0 : index
    %53 = vector.load %arg11[%c0_17, %c0_18] : memref<8x128xf32, #tpu.memory_space<vmem>>, vector<8x128xf32>
    tpu.vector_store %arg11[%c0_17, %c0_18], %52 {strides = array<i32>} : memref<8x128xf32, #tpu.memory_space<vmem>>, vector<8x128xf32>,
    %c7_i32 = arith.constant 7 : i32
    %54 = arith.cmpi eq, %arg1, %c7_i32 : i32
    %55 = arith.extui %54 : i1 to i32
    %c0_i32_19 = arith.constant 0 : i32
    %56 = arith.cmpi ne, %55, %c0_i32_19 : i32
    scf.if %56 {
      %c0_20 = arith.constant 0 : index
      %c0_21 = arith.constant 0 : index
      %57 = vector.load %arg11[%c0_20, %c0_21] : memref<8x128xf32, #tpu.memory_space<vmem>>, vector<8x128xf32>
      %c0_22 = arith.constant 0 : index
      %c0_23 = arith.constant 0 : index
      %58 = vector.load %arg7[%c0_22, %c0_23] : memref<1x128xf32, #tpu.memory_space<vmem>>, vector<1x128xf32>
      %59 = vector.broadcast %58 : vector<1x128xf32> to vector<8x128xf32>
      %60 = arith.addf %57, %59 : vector<8x128xf32>
      %cst_24 = arith.constant 0.000000e+00 : f32
      %61 = vector.broadcast %cst_24 : f32 to vector<8x128xf32>
      %62 = arith.maximumf %60, %61 : vector<8x128xf32>
      %c0_25 = arith.constant 0 : index
      %c0_26 = arith.constant 0 : index
      %63 = vector.load %arg8[%c0_25, %c0_26] : memref<128x128xf32, #tpu.memory_space<vmem>>, vector<128x128xf32>
      %cst_27 = arith.constant dense<0.000000e+00> : vector<8x128xf32>
      %64 = tpu.matmul %62, %63, %cst_27 {dimension_numbers = #tpu.dot_dimension_numbers<[1], [0], [0], [1], [0, 0, 1, 1], [], []>} : vector<8x128xf32>, vector<128x128xf32>, vector<8x128xf32> -> vector<8x128xf32>
      %c0_28 = arith.constant 0 : index
      %c0_29 = arith.constant 0 : index
      %65 = vector.load %arg9[%c0_28, %c0_29] : memref<1x128xf32, #tpu.memory_space<vmem>>, vector<1x128xf32>
      %66 = vector.broadcast %65 : vector<1x128xf32> to vector<8x128xf32>
      %67 = arith.addf %64, %66 : vector<8x128xf32>
      %c0_30 = arith.constant 0 : index
      %c0_31 = arith.constant 0 : index
      %68 = vector.load %arg10[%c0_30, %c0_31] : memref<8x128xf32, #tpu.memory_space<vmem>>, vector<8x128xf32>
      tpu.vector_store %arg10[%c0_30, %c0_31], %67 {strides = array<i32>} : memref<8x128xf32, #tpu.memory_space<vmem>>, vector<8x128xf32>,
    } else {
    }
    return
  }
  func.func @transform_0(%arg0: i32, %arg1: i32) -> (i32, i32) {
    %c0_i32 = arith.constant 0 : i32
    %c0_i32_0 = arith.constant 0 : i32
    return %arg0, %c0_i32 : i32, i32
  }
  func.func @transform_1(%arg0: i32, %arg1: i32) -> (i32, i32) {
    %c0_i32 = arith.constant 0 : i32
    %c0_i32_0 = arith.constant 0 : i32
    return %arg0, %c0_i32 : i32, i32
  }
  func.func @transform_2(%arg0: i32, %arg1: i32) -> (i32, i32, i32) {
    %c0_i32 = arith.constant 0 : i32
    %c0_i32_0 = arith.constant 0 : i32
    %c0_i32_1 = arith.constant 0 : i32
    return %arg1, %c0_i32, %c0_i32_0 : i32, i32, i32
  }
  func.func @transform_3(%arg0: i32, %arg1: i32) -> (i32, i32, i32) {
    %c0_i32 = arith.constant 0 : i32
    %c0_i32_0 = arith.constant 0 : i32
    %c0_i32_1 = arith.constant 0 : i32
    return %arg1, %c0_i32, %c0_i32_0 : i32, i32, i32
  }
  func.func @transform_4(%arg0: i32, %arg1: i32) -> (i32, i32, i32) {
    %c0_i32 = arith.constant 0 : i32
    %c0_i32_0 = arith.constant 0 : i32
    %c0_i32_1 = arith.constant 0 : i32
    return %arg1, %c0_i32, %c0_i32_0 : i32, i32, i32
  }
  func.func @transform_5(%arg0: i32, %arg1: i32) -> (i32, i32) {
    %c0_i32 = arith.constant 0 : i32
    %c0_i32_0 = arith.constant 0 : i32
    %c0_i32_1 = arith.constant 0 : i32
    return %c0_i32, %c0_i32_0 : i32, i32
  }
  func.func @transform_6(%arg0: i32, %arg1: i32) -> (i32, i32) {
    %c0_i32 = arith.constant 0 : i32
    %c0_i32_0 = arith.constant 0 : i32
    %c0_i32_1 = arith.constant 0 : i32
    return %c0_i32, %c0_i32_0 : i32, i32
  }
  func.func @transform_7(%arg0: i32, %arg1: i32) -> (i32, i32) {
    %c0_i32 = arith.constant 0 : i32
    %c0_i32_0 = arith.constant 0 : i32
    %c0_i32_1 = arith.constant 0 : i32
    return %c0_i32, %c0_i32_0 : i32, i32
  }
  func.func @transform_8(%arg0: i32, %arg1: i32) -> (i32, i32) {
    %c0_i32 = arith.constant 0 : i32
    %c0_i32_0 = arith.constant 0 : i32
    return %arg0, %c0_i32 : i32, i32
  }
}

</mosaic_0001>

<bundles_post_ra>
// kernel: cnn_forward.1
= control target key start
LH: loop header
LB: loop body
LE: loop exit
PB: predicated region body
PF: predicated region fallthrough
CT: control target
= control target key end

     0   :  { %s2957_s27 = smov 0   ;;  %s2959_s28 = smov 0   ;;  %s3650_s0 = inlined_call_operand.vmem [shape: f32[16,188], index: 0, kind: input, shape index: {}]   ;;  %s3651_s1 = inlined_call_operand.vmem [shape: f32[16,188], index: 1, kind: input, shape index: {}]   ;;  %s3652_s2 = inlined_call_operand.vmem [shape: f32[64,1,3], index: 2, kind: input, shape index: {}]   ;;  %s3653_s3 = inlined_call_operand.vmem [shape: f32[64,1,1], index: 3, kind: input, shape index: {}]   ;;  %s3654_s4 = inlined_call_operand.vmem [shape: bf16[64,187,128], index: 4, kind: input, shape index: {}]   ;;  %s3655_s5 = inlined_call_operand.vmem [shape: f32[1,128], index: 5, kind: input, shape index: {}]   ;;  %s3656_s6 = inlined_call_operand.vmem [shape: f32[128,128], index: 6, kind: input, shape index: {}]   ;;  %s3657_s7 = inlined_call_operand.vmem [shape: f32[1,128], index: 7, kind: input, shape index: {}]   ;;  %s3658_s8 = inlined_call_operand.vmem [shape: f32[16,128], index: 8, kind: output, shape index: {}]  }
   0x1   :  { %s2961_s29 = smov 0   ;;  %s2963_s30 = smov 0  }
   0x2   :  { %s2965_s9 = smov 0  }
   0x3 LB: > { %s27_s10 = sadd.s32 1, %s2896_s29  ;;  %s30_s11 = sadd.s32 1, %s2900_s30  ;;  %s2904_s9 = sphi %s2965_s9, %s18_s9   ;;  %s2900_s30 = sphi %s2963_s30, %s3662_s30   ;;  %s2896_s29 = sphi %s2961_s29, %s3661_s29   ;;  %s2892_s28 = sphi %s2959_s28, %s3660_s28   ;;  %s2888_s27 = sphi %s2957_s27, %s3659_s27  }
   0x4   : > { %p28_p0 = scmp.ge.s32.totalorder %s27_s10, 8  ;;  %p2275_p1 = scmp.ge.s32.totalorder %s2904_s9, 1 }
   0x5   : > { %p316_p2 = scmp.lt.s32.totalorder %s2904_s9, 17 }
   0x6   : > { %s3664_s10 = smov (%p28_p0, %s27_s10), 0  ;;  %s3666_s11 = smov (!%p28_p0, %s30_s11), %s2900_s30 }
   0x7   : > { %p317_p3 = pnand %p2275_p1, %p316_p2  ;;  %p32_p4 = scmp.ge.s32.totalorder %s3666_s11, 2 }
   0x8   : > { %s2280_s12 = sshll.u32 (!%p317_p3), %s2888_s27, 3  ;;  %p368_p5 = scmp.lt.s32.totalorder (!%p317_p3), %s2892_s28, 1 }
   0x9   : > { %s3668_s11 = smov (%p32_p4, %s3666_s11), 0  ;;  %320 = sbr.rel (%p317_p3) target bundleno = 727 (0x2d7), region = 52 }
   0xa   : > { %p379_p6 = scmp.lt.s32.totalorder (!%p317_p3), %s2280_s12, 63  ;;  %p2677_p7 = scmp.ne.s32.totalorder (!%p317_p3), %s2888_s27, 0 }
   0xe   : > { %v2906_v0 = vmov 1   ;;  %v2907_v1 = vmov 0   ;;  %s3670_s28 = smov (!%p368_p5, %s2892_s28), 1  ;;  %s3672_s12 = smov (!%p379_p6, %s2280_s12), 63  ;;  %v2908_v9 = vmov 2   ;;  %vm1302_vm0 = vcmask 1044480  }
   0xf   : > { %2828 = vset.pattern.permute.xlu0 %v2906_v0  ;;  %2827 = vset.pattern.permute.xlu2 %v2907_v1  ;;  %s3000_s15 = scalar_lea.vmem %s3652_s2, %s3672_s12  ;;  %s2284_s16 = sshll.u32 %s3670_s28, 3  ;;  %vm1303_vm1 = vcmask 1045504   ;;  %vm644_vm2 = vcmask 1039360   ;;  %vm1298_vm3 = vcmask 482304  }
  0x10   : > { %2826 = vset.pattern.permute.xlu1 %v2907_v1  ;;  %v2844_v2 = vld [vmem:[%s3000_s15 + $0x4] ss:$0 sm:$0xff]  ;;  %v2845_v3 = vld [vmem:[%s3000_s15 + $0x2] ss:$0 sm:$0xff]  ;;  %v2846_v4 = vld [vmem:[%s3000_s15 + $0x1] ss:$0 sm:$0xff]  ;;  %s3009_s19 = scalar_lea.vmem %s3658_s8, %s2284_s16  ;;  %s3015_s22 = scalar_lea.vmem %s3653_s3, %s3672_s12 }
  0x11   : > { %453 = vperm.xlu2 %2827, %v2844_v2   ;;  %445 = vperm.xlu1 %2826, %v2845_v3   ;;  %v2847_v5 = vld [vmem:[%s3000_s15 + $0x5] ss:$0 sm:$0xff]  ;;  %v2848_v6 = vld [vmem:[%s3000_s15 + $0x3] ss:$0 sm:$0xff]  ;;  %v2849_v7 = vld [vmem:[%s3000_s15] ss:$0 sm:$0xff] }
  0x12   : > { %489 = vperm.xlu0 %2828, %v2846_v4   ;;  %v2850_v8 = vld [vmem:[%s3000_s15 + $0x6] ss:$0 sm:$0xff]  ;;  %v2852_v10 = vld [vmem:[%s3015_s22 + $0x1] ss:$0 sm:$0xff]  ;;  %v2851_v11 = vld [vmem:[%s3015_s22 + $0x2] ss:$0 sm:$0xff] }
  0x13   : > { %v2853_v12 = vld [vmem:[%s3015_s22] ss:$0 sm:$0xff]  ;;  %v3027_v13 = vld [vmem:[%s3000_s15 + $0x7] ss:$0 sm:$0xff]  ;;  %s2681_s23 = sshll.u32 %s3670_s28, 4  ;;  %s2909_s28 = smov 127  }
  0x14   : > { %s3043_s26 = scalar_lea.vmem %s3650_s0, %s2681_s23  ;;  %s3064_s15 = scalar_lea.vmem %s3651_s1, %s2681_s23 }
  0x15   : > { %v3046_v17 = vld [vmem:[%s3043_s26] sm:$0xff]  ;;  %v3049_v18 = vld [vmem:[%s3043_s26 + $0x8] sm:$0xff]  ;;  %s2779_s16 = smul.u32 96, %s3672_s12 }
  0x16   : > { %v3069_v26 = vld [vmem:[%s3064_s15] sm:$0xff]  ;;  %v3078_v30 = vld [vmem:[%s3064_s15 + $0x8] sm:$0xff] }
  0x17   : > { %s3208_s20 = scalar_lea.vmem %s3654_s4, %s2779_s16 }
  0x19   : > { %457 = vperm.xlu2 %2827, %v2847_v5   ;;  %449 = vperm.xlu1 %2826, %v2848_v6  }
  0x1a   : > { %485 = vperm.xlu0 %2828, %v2849_v7  }
  0x21   : > { %461 = vperm.xlu2 %2827, %v2850_v8   ;;  %2829 = vset.pattern.permute.xlu1 %v2908_v9 }
  0x22   : > { %501 = vperm.xlu0 %2828, %v2844_v2   ;;  %553 = vperm.xlu1 %2829, %v2846_v4  }
  0x29   : > { %2831 = vset.pattern.permute.xlu2 %v2908_v9 }
  0x2a   : > { %2834 = vset.pattern.permute.xlu0 %v2907_v1  ;;  %557 = vperm.xlu2 %2831, %v2845_v3  }
  0x2b   : > { %2830 = vset.pattern.permute.xlu1 %v2906_v0  ;;  %437 = vperm.xlu0 %2834, %v2849_v7  }
  0x2c   : > { %493 = vperm.xlu1 %2830, %v2845_v3  }
  0x32   : > { %2833 = vset.pattern.permute.xlu2 %v2906_v0 }
  0x33   : > { %441 = vperm.xlu0 %2834, %v2846_v4   ;;  %497 = vperm.xlu2 %2833, %v2848_v6  }
  0x34   : > { %2832 = vset.pattern.permute.xlu1 %v2908_v9 }
  0x35   : > { %549 = vperm.xlu1 %2832, %v2849_v7  }
  0x3b   : > { %706 = vperm.xlu0 %2834, %v2852_v10   ;;  %2835 = vset.pattern.permute.xlu2 %v2908_v9 }
  0x3c   : > { %565 = vperm.xlu2 %2835, %v2844_v2  }
  0x3d   : > { %561 = vperm.xlu1 %2832, %v2848_v6  }
  0x43   : > { %702 = vperm.xlu0 %2834, %v2853_v12  }
  0x44   : > { %569 = vperm.xlu2 %2835, %v2847_v5  }
  0x45   : > { %2836 = vset.pattern.permute.xlu1 %v2906_v0 }
  0x46   : > { %505 = vperm.xlu1 %2836, %v2847_v5  }
  0x4c   : > { %2839 = vset.pattern.permute.xlu2 %v2906_v0 }
  0x4d   : > { %513 = vperm.xlu2 %2839, %v3027_v13  }
  0x4e   : > { %2837 = vset.pattern.permute.xlu1 %v2907_v1 }
  0x4f   : > { %710 = vperm.xlu1 %2837, %v2851_v11  }
  0x55   : > { %2841 = vset.pattern.permute.xlu2 %v2908_v9 }
  0x56   : > { %577 = vperm.xlu2 %2841, %v3027_v13  }
  0x57   : > { %2838 = vset.pattern.permute.xlu1 %v2906_v0 }
  0x58   : > { %509 = vperm.xlu1 %2838, %v2850_v8  }
  0x5e   : > { %2843 = vset.pattern.permute.xlu2 %v2907_v1 }
  0x60   : > { %2840 = vset.pattern.permute.xlu1 %v2908_v9 }
  0x61   : > { %573 = vperm.xlu1 %2840, %v2850_v8  }
  0x69   : > { %2842 = vset.pattern.permute.xlu1 %v2907_v1 }
  0x6b   : > { %v3031_v14 = vpop.permute.xlu2 %453 }
  0x6c   : > { %v476_v36 = vmul.f32 %v3031_v14, %v3046_v17  ;;  %v477_v39 = vmul.f32 %v3031_v14, %v3049_v18 }
  0x73   : > { %v3034_v15 = vpop.permute.xlu2 %457 }
  0x74   : > { %v478_v10 = vmul.f32 %v3034_v15, %v3046_v17 }
  0x7b   : > { %v3037_v16 = vpop.permute.xlu2 %461 }
  0x83   : > { %v3051_v19 = vpop.permute.xlu1 %445 }
  0x84   : > { %v3053_v20 = vpop.permute.xlu0 %489  ;;  %v558_v21 = vpop.permute.xlu2 %557  ;;  %v472_v47 = vmul.f32 %v3051_v19, %v3046_v17  ;;  %v473_v49 = vmul.f32 %v3051_v19, %v3049_v18 }
  0x85   : > { %v768_v22 = vmul.f32 %v3053_v20, %v3049_v18  ;;  %v767_v23 = vmul.f32 %v3053_v20, %v3046_v17  ;;  %v584_v46 = vmul.f32 %v558_v21, %v3046_v17  ;;  %v874_v0 = vmul.f32 %v558_v21, %v3078_v30 }
  0x86   : > { %v585_v2 = vmul.f32 %v558_v21, %v3049_v18  ;;  %v873_v6 = vmul.f32 %v558_v21, %v3069_v26  ;;  %v479_v21 = vmul.f32 %v3034_v15, %v3049_v18 }
  0x87   : > { %803 = vrot.lane.b32.xlu1 %v768_v22, %s2909_s28  ;;  %801 = vrot.lane.b32.xlu0 %v767_v23, %s2909_s28 }
  0x8b   : > { %v3066_v24 = vpop.permute.xlu1 %449 }
  0x8c   : > { %v486_v25 = vpop.permute.xlu0 %485  ;;  %v474_v28 = vmul.f32 %v3066_v24, %v3046_v17  ;;  %v475_v31 = vmul.f32 %v3066_v24, %v3049_v18 }
  0x8d   : > { %v3071_v27 = vpop.permute.xlu2 %497  ;;  %v516_v50 = vmul.f32 %v486_v25, %v3069_v26  ;;  %v517_v54 = vmul.f32 %v486_v25, %v3078_v30  ;;  %v766_v4 = vmul.f32 %v486_v25, %v3049_v18  ;;  %v765_v9 = vmul.f32 %v486_v25, %v3046_v17 }
  0x8e   : > { %v522_v29 = vmul.f32 %v3071_v27, %v3069_v26  ;;  %v523_v32 = vmul.f32 %v3071_v27, %v3078_v30  ;;  %v771_v8 = vmul.f32 %v3071_v27, %v3046_v17 }
  0x90   : > { %v3084_v33 = vadd.f32 %v522_v29, %v474_v28  ;;  %v3086_v34 = vadd.f32 %v523_v32, %v475_v31 }
  0x94   : > { %v3088_v35 = vpop.permute.xlu0 %501  ;;  %v554_v38 = vpop.permute.xlu1 %553 }
  0x95   : > { %v524_v37 = vmul.f32 %v3088_v35, %v3069_v26  ;;  %v525_v40 = vmul.f32 %v3088_v35, %v3078_v30  ;;  %v871_v41 = vmul.f32 %v554_v38, %v3069_v26  ;;  %v583_v42 = vmul.f32 %v554_v38, %v3049_v18 }
  0x96   : > { %v582_v43 = vmul.f32 %v554_v38, %v3046_v17  ;;  %v872_v56 = vmul.f32 %v554_v38, %v3078_v30  ;;  %v774_v31 = vmul.f32 %v3088_v35, %v3049_v18  ;;  %v773_v38 = vmul.f32 %v3088_v35, %v3046_v17 }
  0x97   : > { %v3101_v44 = vadd.f32 %v525_v40, %v477_v39  ;;  %v3103_v45 = vadd.f32 %v524_v37, %v476_v36  ;;  %905 = vrot.lane.b32.xlu1 %v871_v41, %s2909_s28  ;;  %618 = vrot.lane.b32.xlu0 %v583_v42, %s2909_s28  ;;  %v566_v36 = vpop.permute.xlu2 %565  ;;  %v772_v39 = vmul.f32 %v3071_v27, %v3049_v18 }
  0x98   : > { %616 = vrot.lane.b32.xlu2 %v582_v43, %s2909_s28  ;;  %v588_v37 = vmul.f32 %v566_v36, %v3046_v17  ;;  %v480_v41 = vmul.f32 %v3037_v16, %v3046_v17  ;;  %v481_v35 = vmul.f32 %v3037_v16, %v3049_v18 }
  0x9d   : > { %v3111_v48 = vpop.permute.xlu0 %437 }
  0x9e   : > { %v468_v51 = vmul.f32 %v3111_v48, %v3046_v17  ;;  %v494_v52 = vpop.permute.xlu1 %493  ;;  %v469_v53 = vmul.f32 %v3111_v48, %v3049_v18 }
  0x9f   : > { %v520_v55 = vmul.f32 %v494_v52, %v3069_v26  ;;  %v769_v57 = vmul.f32 %v494_v52, %v3046_v17  ;;  %v521_v58 = vmul.f32 %v494_v52, %v3078_v30  ;;  %620 = vrot.lane.b32.xlu0 %v584_v46, %s2909_s28  ;;  %v770_v63 = vmul.f32 %v494_v52, %v3049_v18 }
  0xa0   : > { %v3126_v59 = vadd.f32 %v517_v54, %v469_v53  ;;  %v3128_v60 = vadd.f32 %v516_v50, %v468_v51  ;;  %907 = vrot.lane.b32.xlu2 %v872_v56, %s2909_s28  ;;  %v2855_v51 = vld [vmem:[%s3015_s22 + $0x3] ss:$0 sm:$0xff]  ;;  %v570_v53 = vpop.permute.xlu2 %569  ;;  %v589_v54 = vmul.f32 %v566_v36, %v3049_v18 }
  0xa1   : > { %805 = vrot.lane.b32.xlu1 %v769_v57, %s2909_s28  ;;  %v3132_v61 = vadd.f32 %v521_v58, %v473_v49  ;;  %v3134_v62 = vadd.f32 %v520_v55, %v472_v47  ;;  %v2702_v55 = vld [vmem:[%s3208_s20 + $0x98] sm:$0xff]  ;;  %v878_v57 = vmul.f32 %v566_v36, %v3078_v30  ;;  %v2701_v58 = vld [vmem:[%s3208_s20 + $0x90] sm:$0xff] }
  0xa2   : > { %1418 = vmatpush.bf16.msra.mxu2 %v2702_v55 }
  0xa6   : > { %1419 = vmatpush.bf16.msra.mxu2 %v2701_v58 }
  0xa7   : > { %v550_v1 = vpop.permute.xlu1 %549  ;;  %911 = vrot.lane.b32.xlu0 %v874_v0, %s2909_s28 }
  0xa8   : > { %807 = vrot.lane.b32.xlu2 %v770_v63, %s2909_s28  ;;  %v581_v3 = vmul.f32 %v550_v1, %v3049_v18  ;;  %v580_v7 = vmul.f32 %v550_v1, %v3046_v17  ;;  %v870_v28 = vmul.f32 %v550_v1, %v3078_v30  ;;  %v869_v29 = vmul.f32 %v550_v1, %v3069_v26  ;;  %v3218_v0 = vpop.permute.xlu2 %513  ;;  %v2700_v1 = vld [vmem:[%s3208_s20 + $0x88] sm:$0xff] }
  0xa9   : > { %622 = vrot.lane.b32.xlu1 %v585_v2, %s2909_s28  ;;  %v877_v63 = vmul.f32 %v566_v36, %v3069_v26  ;;  %v2697_v36 = vld [vmem:[%s3208_s20 + $0x70] sm:$0xff] }
  0xaa   : > { %1420 = vmatpush.bf16.msra.mxu2 %v2700_v1  ;;  %v2690_v1 = vld [vmem:[%s3208_s20 + $0x38] sm:$0xff] }
  0xab   : > { %1309 = vmatpush.bf16.msra.mxu0 %v2690_v1 }
  0xaf   : > { %v562_v5 = vpop.permute.xlu1 %561  ;;  %799 = vrot.lane.b32.xlu0 %v766_v4, %s2909_s28  ;;  %v2699_v4 = vld [vmem:[%s3208_s20 + $0x80] sm:$0xff] }
  0xb0   : > { %909 = vrot.lane.b32.xlu2 %v873_v6, %s2909_s28  ;;  %v587_v47 = vmul.f32 %v562_v5, %v3049_v18  ;;  %v586_v49 = vmul.f32 %v562_v5, %v3046_v17  ;;  %v876_v50 = vmul.f32 %v562_v5, %v3078_v30  ;;  %v875_v52 = vmul.f32 %v562_v5, %v3069_v26  ;;  %v3228_v6 = vpop.permute.xlu0 %441 }
  0xb1   : > { %614 = vrot.lane.b32.xlu1 %v581_v3, %s2909_s28  ;;  %v2856_v3 = vld [vmem:[%s3015_s22 + $0x4] ss:$0 sm:$0xff]  ;;  %v879_v5 = vmul.f32 %v570_v53, %v3069_v26  ;;  %1421 = vmatpush.bf16.msra.mxu2 %v2699_v4 }
  0xb7   : > { %612 = vrot.lane.b32.xlu0 %v580_v7, %s2909_s28  ;;  %v2380_v7 = vld [vmem:[%s3208_s20 + $0xb8] sm:$0xf] }
  0xb8   : > { %v506_v11 = vpop.permute.xlu1 %505  ;;  %797 = vrot.lane.b32.xlu2 %v765_v9, %s2909_s28  ;;  %v3234_v9 = vpop.permute.xlu2 %577 }
  0xb9   : > { %v526_v12 = vmul.f32 %v506_v11, %v3069_v26  ;;  %809 = vrot.lane.b32.xlu1 %v771_v8, %s2909_s28  ;;  %v527_v22 = vmul.f32 %v506_v11, %v3078_v30  ;;  %v776_v56 = vmul.f32 %v506_v11, %v3049_v18  ;;  %v775_v2 = vmul.f32 %v506_v11, %v3046_v17  ;;  %v2706_v8 = vld [vmem:[%s3208_s20 + $0xb8] sm:$0x30] }
  0xbb   : > { %v3161_v23 = vadd.f32 %v527_v22, %v479_v21  ;;  %v3163_v25 = vadd.f32 %v526_v12, %v478_v10  ;;  %v2910_v10 = vmov 65535   ;;  %v2381_v12 = vor.u32 %v2706_v8, %v2380_v7  ;;  %v2698_v22 = vld [vmem:[%s3208_s20 + $0x78] sm:$0xff]  ;;  %v2689_v7 = vld [vmem:[%s3208_s20 + $0x30] sm:$0xff] }
  0xbc   : > { %v1304_v11 = vsel %vm1302_vm0, 4294967295, %v2910_v10  ;;  %1422 = vmatpush.bf16.msra.mxu2 %v2698_v22  ;;  %v2331_v10 = vld [vmem:[%s3208_s20 + $0x58] sm:$0xf]  ;;  %1310 = vmatpush.bf16.msra.mxu0 %v2689_v7 }
  0xbd   : > { %v3236_v21 = vsel %vm1303_vm1, %v1304_v11, 0  ;;  %v2694_v11 = vld [vmem:[%s3208_s20 + $0x58] sm:$0x30] }
  0xbf   : > { %903 = vrot.lane.b32.xlu0 %v870_v28, %s2909_s28  ;;  %v1416_v28 = vand.u32 %v2381_v12, %v3236_v21 }
  0xc0   : > { %901 = vrot.lane.b32.xlu2 %v869_v29, %s2909_s28  ;;  %v591_v29 = vmul.f32 %v570_v53, %v3049_v18  ;;  %1423 = vmatpush.bf16.msra.mxu2 %v2697_v36  ;;  %v470_v36 = vmul.f32 %v3228_v6, %v3046_v17 }
  0xc1   : > { %815 = vrot.lane.b32.xlu1 %v774_v31, %s2909_s28  ;;  %v3172_v32 = vpop.permute.xlu1 %710  ;;  %1435 = vmatpush.bf16.msra.mxu3 %v1416_v28  ;;  %v590_v31 = vmul.f32 %v570_v53, %v3046_v17  ;;  %v471_v28 = vmul.f32 %v3228_v6, %v3049_v18 }
  0xc7   : > { %813 = vrot.lane.b32.xlu0 %v773_v38, %s2909_s28  ;;  %v3244_v38 = vpop.permute.xlu0 %706 }
  0xc8   : > { %811 = vrot.lane.b32.xlu2 %v772_v39, %s2909_s28 }
  0xc9   : > { %628 = vrot.lane.b32.xlu1 %v588_v37, %s2909_s28  ;;  %v2705_v37 = vld [vmem:[%s3208_s20 + $0xb0] sm:$0xff] }
  0xca   : > { %v3182_v40 = vpop.permute.xlu1 %509  ;;  %1436 = vmatpush.bf16.msra.mxu3 %v2705_v37  ;;  %v2688_v37 = vld [vmem:[%s3208_s20 + $0x28] sm:$0xff] }
  0xcb   : > { %v528_v42 = vmul.f32 %v3182_v40, %v3069_v26  ;;  %v529_v27 = vmul.f32 %v3182_v40, %v3078_v30  ;;  %1311 = vmatpush.bf16.msra.mxu0 %v2688_v37  ;;  %v2685_v37 = vld [vmem:[%s3208_s20 + $0x10] sm:$0xff] }
  0xcd   : > { %v3192_v43 = vadd.f32 %v529_v27, %v481_v35  ;;  %v3194_v46 = vadd.f32 %v528_v42, %v480_v41  ;;  %v2696_v41 = vld [vmem:[%s3208_s20 + $0x68] sm:$0xff]  ;;  %v2857_v35 = vld [vmem:[%s3015_s22 + $0x5] ss:$0 sm:$0xff]  ;;  %v779_v27 = vmul.f32 %v3218_v0, %v3046_v17 }
  0xce   : > { %v2704_v42 = vld [vmem:[%s3208_s20 + $0xa8] sm:$0xff]  ;;  %1424 = vmatpush.bf16.msra.mxu2 %v2696_v41 }
  0xcf   : > { %626 = vrot.lane.b32.xlu0 %v587_v47, %s2909_s28  ;;  %1437 = vmatpush.bf16.msra.mxu3 %v2704_v42  ;;  %v2695_v47 = vld [vmem:[%s3208_s20 + $0x60] sm:$0xff]  ;;  %v780_v42 = vmul.f32 %v3218_v0, %v3049_v18 }
  0xd0   : > { %624 = vrot.lane.b32.xlu2 %v586_v49, %s2909_s28  ;;  %v2703_v49 = vld [vmem:[%s3208_s20 + $0xa0] sm:$0xff] }
  0xd1   : > { %915 = vrot.lane.b32.xlu1 %v876_v50, %s2909_s28  ;;  %v880_v50 = vmul.f32 %v570_v53, %v3078_v30  ;;  %v778_v53 = vmul.f32 %v3182_v40, %v3049_v18 }
  0xd2   : > { %1425 = vmatpush.bf16.msra.mxu2 %v2695_v47  ;;  %v2715_v47 = vld [vmem:[%s3208_s20 + $0x100] sm:$0xff] }
  0xd3   : > { %1438 = vmatpush.bf16.msra.mxu3 %v2703_v49  ;;  %v518_v49 = vmul.f32 %v3053_v20, %v3069_v26 }
  0xd7   : > { %913 = vrot.lane.b32.xlu0 %v875_v52, %s2909_s28  ;;  %v2429_v52 = vld [vmem:[%s3208_s20 + $0x118] sm:$0xf] }
  0xd8   : > { %630 = vrot.lane.b32.xlu2 %v589_v54, %s2909_s28  ;;  %v2718_v54 = vld [vmem:[%s3208_s20 + $0x118] sm:$0x30] }
  0xd9   : > { %714 = vperm.xlu1 %2842, %v2855_v51   ;;  %v3259_v51 = vpop.permute.xlu1 %573 }
  0xda   : > { %v593_v58 = vmul.f32 %v3259_v51, %v3049_v18  ;;  %v592_v8 = vmul.f32 %v3259_v51, %v3046_v17  ;;  %v881_v22 = vmul.f32 %v3259_v51, %v3069_v26 }
  0xdf   : > { %919 = vrot.lane.b32.xlu0 %v878_v57, %s2909_s28  ;;  %v777_v57 = vmul.f32 %v3182_v40, %v3046_v17  ;;  %v752_v40 = vmul.f32 %v3228_v6, %v3078_v30 }
  0xe0   : > { %917 = vrot.lane.b32.xlu2 %v877_v63, %s2909_s28 }
  0xe1   : > { %819 = vrot.lane.b32.xlu1 %v776_v56, %s2909_s28  ;;  %v2430_v56 = vor.u32 %v2718_v54, %v2429_v52 }
  0xe3   : > { %v1525_v63 = vand.u32 %v2430_v56, %v3236_v21 }
  0xe5   : > { %1544 = vmatpush.bf16.msrb.mxu3 %v1525_v63  ;;  %v2687_v63 = vld [vmem:[%s3208_s20 + $0x20] sm:$0xff] }
  0xe6   : > { %1312 = vmatpush.bf16.msra.mxu0 %v2687_v63 }
  0xe7   : > { %817 = vrot.lane.b32.xlu0 %v775_v2, %s2909_s28  ;;  %v2717_v2 = vld [vmem:[%s3208_s20 + $0x110] sm:$0xff] }
  0xe8   : > { %718 = vperm.xlu2 %2843, %v2856_v3  }
  0xe9   : > { %921 = vrot.lane.b32.xlu1 %v879_v5, %s2909_s28  ;;  %1545 = vmatpush.bf16.msrb.mxu3 %v2717_v2 }
  0xef   : > { %634 = vrot.lane.b32.xlu0 %v591_v29, %s2909_s28  ;;  %v2716_v29 = vld [vmem:[%s3208_s20 + $0x108] sm:$0xff] }
  0xf0   : > { %632 = vrot.lane.b32.xlu2 %v590_v31, %s2909_s28  ;;  %v2332_v31 = vor.u32 %v2694_v11, %v2331_v10  ;;  %1546 = vmatpush.bf16.msrb.mxu3 %v2716_v29  ;;  %v884_v29 = vmul.f32 %v3234_v9, %v3078_v30 }
  0xf1   : > { %465 = vperm.xlu1 %2842, %v3027_v13   ;;  %v3263_v13 = vpop.permute.xlu0 %702 }
  0xf2   : > { %v3249_v39 = vpop.permute.xlu2 %616 }
  0xf4   : > { %1547 = vmatpush.bf16.msrb.mxu3 %v2715_v47  ;;  %v883_v47 = vmul.f32 %v3234_v9, %v3069_v26 }
  0xf7   : > { %722 = vperm.xlu0 %2834, %v2857_v35   ;;  %v519_v35 = vmul.f32 %v3053_v20, %v3078_v30  ;;  %v2693_v20 = vld [vmem:[%s3208_s20 + $0x50] sm:$0xff] }
  0xf8   : > { %923 = vrot.lane.b32.xlu2 %v880_v50, %s2909_s28  ;;  %v751_v50 = vmul.f32 %v3228_v6, %v3069_v26 }
  0xf9   : > { %825 = vrot.lane.b32.xlu1 %v779_v27, %s2909_s28  ;;  %v804_v3 = vpop.permute.xlu1 %803  ;;  %v802_v4 = vpop.permute.xlu0 %801  ;;  %v1307_v27 = vand.u32 %v2332_v31, %v3236_v21  ;;  %v535_v54 = vadd.f32 %v519_v35, %v471_v28  ;;  %v594_v28 = vmul.f32 %v3234_v9, %v3046_v17 }
  0xfa   : > { %v908_v55 = vpop.permute.xlu2 %907  ;;  %v856_v12 = vadd.f32 %v804_v3, %v752_v40  ;;  %v830_v41 = vsel %vm644_vm2, %v802_v4, %v804_v3 }
  0xfb   : > { %v855_v56 = vadd.f32 %v830_v41, %v751_v50  ;;  %1326 = vmatpush.bf16.msra.mxu1 %v1307_v27  ;;  %v2691_v41 = vld [vmem:[%s3208_s20 + $0x40] sm:$0xff]  ;;  %v2714_v27 = vld [vmem:[%s3208_s20 + $0xf8] sm:$0xff] }
  0xfc   : > { %v960_v52 = vadd.f32 %v908_v55, %v856_v12  ;;  %v595_v12 = vmul.f32 %v3234_v9, %v3049_v18  ;;  %v753_v9 = vmul.f32 %v3051_v19, %v3069_v26 }
  0xfe   : > { %v976_v7 = vadd.f32 %v960_v52, %v3244_v38  ;;  %v754_v52 = vmul.f32 %v3051_v19, %v3078_v30 }
  0xff   : > { %823 = vrot.lane.b32.xlu0 %v778_v53, %s2909_s28  ;;  %1327 = vmatpush.bf16.msra.mxu1 %v2693_v20 }
 0x100   : > { %821 = vrot.lane.b32.xlu2 %v777_v57, %s2909_s28 }
 0x101   : > { %638 = vrot.lane.b32.xlu1 %v593_v58, %s2909_s28  ;;  %v534_v58 = vadd.f32 %v518_v49, %v470_v36 }
 0x102   : > { %v3281_v5 = vpop.permute.xlu2 %807 }
 0x103   : > { %v858_v20 = vadd.f32 %v3281_v5, %v754_v52  ;;  %v2709_v52 = vld [vmem:[%s3208_s20 + $0xd0] sm:$0xff] }
 0x107   : > { %636 = vrot.lane.b32.xlu0 %v592_v8, %s2909_s28 }
 0x108   : > { %827 = vrot.lane.b32.xlu2 %v780_v42, %s2909_s28 }
 0x109   : > { %925 = vrot.lane.b32.xlu1 %v881_v22, %s2909_s28  ;;  %v906_v53 = vpop.permute.xlu1 %905  ;;  %v619_v57 = vpop.permute.xlu0 %618 }
 0x10a   : > { %v934_v6 = vsel %vm644_vm2, %v906_v53, %v908_v55  ;;  %v646_v1 = vsel %vm644_vm2, %v3249_v39, %v619_v57  ;;  %v672_v2 = vadd.f32 %v619_v57, %v535_v54  ;;  %v910_v3 = vpop.permute.xlu2 %909  ;;  %v2686_v39 = vld [vmem:[%s3208_s20 + $0x18] sm:$0xff]  ;;  %v2692_v55 = vld [vmem:[%s3208_s20 + $0x48] sm:$0xff]  ;;  %v2713_v57 = vld [vmem:[%s3208_s20 + $0xf0] sm:$0xff] }
 0x10b   : > { %v959_v4 = vadd.f32 %v934_v6, %v855_v56  ;;  %v671_v40 = vadd.f32 %v646_v1, %v534_v58  ;;  %1313 = vmatpush.bf16.msra.mxu0 %v2686_v39  ;;  %1328 = vmatpush.bf16.msra.mxu1 %v2692_v55  ;;  %v882_v56 = vmul.f32 %v3259_v51, %v3078_v30  ;;  %v2684_v53 = vld [vmem:[%s3208_s20 + $0x8] sm:$0xff]  ;;  %v2858_v55 = vld [vmem:[%s3015_s22 + $0x6] ss:$0 sm:$0xff] }
 0x10c   : > { %v736_v8 = vadd.f32 %v3244_v38, %v672_v2 }
 0x10d   : > { %v975_v10 = vadd.f32 %v959_v4, %v3244_v38  ;;  %v735_v11 = vadd.f32 %v3244_v38, %v671_v40 }
 0x10e   : > { %v992_v22 = vmax.f32 %v736_v8, %v976_v7 }
 0x10f   : > { %642 = vrot.lane.b32.xlu0 %v595_v12, %s2909_s28  ;;  %v991_v38 = vmax.f32 %v735_v11, %v975_v10  ;;  %1314 = vmatpush.bf16.msra.mxu0 %v2685_v37  ;;  %v2859_v10 = vld [vmem:[%s3015_s22 + $0x7] ss:$0 sm:$0xff]  ;;  %v2712_v11 = vld [vmem:[%s3208_s20 + $0xe8] sm:$0xff]  ;;  %v2726_v12 = vld [vmem:[%s3208_s20 + $0x158] sm:$0xff] }
 0x110   : > { %640 = vrot.lane.b32.xlu2 %v594_v28, %s2909_s28  ;;  %v1008_v18 = vmax.f32 %v992_v22, 0.0  ;;  %1329 = vmatpush.bf16.msra.mxu1 %v2691_v41 }
 0x111   : > { %931 = vrot.lane.b32.xlu1 %v884_v29, %s2909_s28  ;;  %v621_v31 = vpop.permute.xlu0 %620  ;;  %v1007_v36 = vmax.f32 %v991_v38, 0.0 }
 0x112   : > { %v3332_v17 = vpop.permute.xlu2 %797 }
 0x113   : > { %v806_v42 = vpop.permute.xlu1 %805  ;;  %v1022_v35 = vpack.c.bf16 %v1008_v18, %v1007_v36  ;;  %1315 = vmatpush.bf16.msra.mxu0 %v2684_v53  ;;  %v2725_v18 = vld [vmem:[%s3208_s20 + $0x150] sm:$0xff]  ;;  %v2478_v53 = vld [vmem:[%s3208_s20 + $0x178] sm:$0xf] }
 0x114   : > { %v831_v54 = vsel %vm644_vm2, %v806_v42, %v3281_v5  ;;  %1527 = vmatpush.bf16.msrb.mxu1 %v2714_v27  ;;  %v2683_v5 = vld [vmem:[%s3208_s20] sm:$0xff]  ;;  %v2710_v42 = vld [vmem:[%s3208_s20 + $0xd8] sm:$0xff] }
 0x115   : > { %v1336_v49 = vunpack.c.l.b16 %v1022_v35  ;;  %v1337_v50 = vunpack.c.h.b16 %v1022_v35  ;;  %v857_v6 = vadd.f32 %v831_v54, %v753_v9  ;;  %v2724_v35 = vld [vmem:[%s3208_s20 + $0x148] sm:$0xff]  ;;  %v2738_v27 = vld [vmem:[%s3208_s20 + $0x1b8] sm:$0xff]  ;;  %v2723_v54 = vld [vmem:[%s3208_s20 + $0x140] sm:$0xff] }
 0x117   : > { %929 = vrot.lane.b32.xlu0 %v883_v47, %s2909_s28  ;;  %v1338_v58 = vpack.c.b16 %v1336_v49, %v1336_v49  ;;  %v1339_v63 = vpack.c.b16 %v1337_v50, %v1337_v50  ;;  %1316 = vmatpush.bf16.msra.mxu0 %v2683_v5  ;;  %v2737_v49 = vld [vmem:[%s3208_s20 + $0x1b0] sm:$0xff] }
 0x118   : > { %927 = vrot.lane.b32.xlu2 %v882_v56, %s2909_s28  ;;  %1528 = vmatpush.bf16.msrb.mxu1 %v2713_v57  ;;  %v2730_v57 = vld [vmem:[%s3208_s20 + $0x178] sm:$0x30] }
 0x119   : > { %v912_v51 = vpop.permute.xlu0 %911  ;;  %1426 = vmatmul.bf16.vlgmr.msra.gmra.mxu2 %v1338_v58  ;;  %2382 = vmatmul.msk.bf16.vlgmr.msra.gmra.mxu3 %vm1298_vm3, %v1339_v63  ;;  %v2479_v58 = vor.u32 %v2730_v57, %v2478_v53 }
 0x11a   : > { %v935_v19 = vsel %vm644_vm2, %v910_v3, %v912_v51  ;;  %v962_v1 = vadd.f32 %v912_v51, %v858_v20  ;;  %v3352_v2 = vpop.permute.xlu2 %901  ;;  %1745 = vmatpush.bf16.msra.mxu3 %v2738_v27  ;;  %v2722_v51 = vld [vmem:[%s3208_s20 + $0x138] sm:$0xff]  ;;  %v2719_v27 = vld [vmem:[%s3208_s20 + $0x120] sm:$0xff] }
 0x11b   : > { %v623_v4 = vpop.permute.xlu1 %622  ;;  %v961_v40 = vadd.f32 %v935_v19, %v857_v6  ;;  %1636 = vmatpush.bf16.msrb.mxu0 %v2726_v12  ;;  %v2708_v6 = vld [vmem:[%s3208_s20 + $0xc8] sm:$0xff]  ;;  %v1634_v19 = vand.u32 %v2479_v58, %v3236_v21 }
 0x11c   : > { %v647_v7 = vsel %vm644_vm2, %v621_v31, %v623_v4  ;;  %v674_v8 = vadd.f32 %v623_v4, %v3132_v61  ;;  %v978_v39 = vadd.f32 %v962_v1, %v3172_v32  ;;  %1529 = vmatpush.bf16.msrb.mxu1 %v2712_v11  ;;  %v2711_v61 = vld [vmem:[%s3208_s20 + $0xe0] sm:$0xff]  ;;  %v2736_v1 = vld [vmem:[%s3208_s20 + $0x1a8] sm:$0xff]  ;;  %v750_v4 = vmul.f32 %v3111_v48, %v3078_v30  ;;  %v2729_v11 = vld [vmem:[%s3208_s20 + $0x170] sm:$0xff] }
 0x11d   : > { %v673_v3 = vadd.f32 %v647_v7, %v3134_v62  ;;  %v977_v22 = vadd.f32 %v961_v40, %v3172_v32  ;;  %1653 = vmatpush.bf16.msrb.mxu2 %v1634_v19  ;;  %v749_v7 = vmul.f32 %v3111_v48, %v3069_v26 }
 0x11e   : > { %v738_v28 = vadd.f32 %v3172_v32, %v674_v8  ;;  %1746 = vmatpush.bf16.msra.mxu3 %v2737_v49  ;;  %v2707_v8 = vld [vmem:[%s3208_s20 + $0xc0] sm:$0xff] }
 0x11f   : > { %v737_v29 = vadd.f32 %v3172_v32, %v673_v3  ;;  %730 = vperm.xlu0 %2834, %v2859_v10   ;;  %1637 = vmatpush.bf16.msrb.mxu0 %v2725_v18  ;;  %v2721_v10 = vld [vmem:[%s3208_s20 + $0x130] sm:$0xff]  ;;  %v2735_v3 = vld [vmem:[%s3208_s20 + $0x1a0] sm:$0xff]  ;;  %v2734_v18 = vld [vmem:[%s3208_s20 + $0x198] sm:$0xff] }
 0x120   : > { %v994_v38 = vmax.f32 %v738_v28, %v978_v39  ;;  %726 = vperm.xlu2 %2843, %v2858_v55   ;;  %1530 = vmatpush.bf16.msrb.mxu1 %v2711_v61  ;;  %v2727_v49 = vld [vmem:[%s3208_s20 + $0x160] sm:$0xff] }
 0x121   : > { %v993_v31 = vmax.f32 %v737_v29, %v977_v22  ;;  %v800_v36 = vpop.permute.xlu0 %799  ;;  %1654 = vmatpush.bf16.msrb.mxu2 %v2729_v11 }
 0x122   : > { %v1010_v62 = vmax.f32 %v994_v38, 0.0  ;;  %v3368_v41 = vpop.permute.xlu2 %811  ;;  %1747 = vmatpush.bf16.msra.mxu3 %v2736_v1  ;;  %v829_v5 = vsel %vm644_vm2, %v3332_v17, %v800_v36  ;;  %v854_v12 = vadd.f32 %v800_v36, %v750_v4  ;;  %v2720_v38 = vld [vmem:[%s3208_s20 + $0x128] sm:$0xff] }
 0x123   : > { %v1009_v37 = vmax.f32 %v993_v31, 0.0  ;;  %v615_v32 = vpop.permute.xlu1 %614  ;;  %1638 = vmatpush.bf16.msrb.mxu0 %v2724_v35  ;;  %v853_v55 = vadd.f32 %v829_v5, %v749_v7  ;;  %v2731_v7 = vld [vmem:[%s3208_s20 + $0x180] sm:$0xff] }
 0x124   : > { %1531 = vmatpush.bf16.msrb.mxu1 %v2710_v42  ;;  %v670_v39 = vadd.f32 %v615_v32, %v3126_v59  ;;  %v2742_v42 = vld [vmem:[%s3208_s20 + $0x1d8] sm:$0x30] }
 0x125   : > { %v3373_v47 = vpack.c.bf16 %v1010_v62, %v1009_v37 }
 0x126   : > { %1748 = vmatpush.bf16.msra.mxu3 %v2735_v3  ;;  %v734_v31 = vadd.f32 %v3263_v13, %v670_v39  ;;  %v2741_v39 = vld [vmem:[%s3208_s20 + $0x1d0] sm:$0xff]  ;;  %v2747_v3 = vld [vmem:[%s3208_s20 + $0x200] sm:$0xff] }
 0x127   : > { %v1446_v50 = vunpack.c.h.b16 %v3373_v47  ;;  %1639 = vmatpush.bf16.msrb.mxu0 %v2723_v54  ;;  %v2750_v54 = vld [vmem:[%s3208_s20 + $0x218] sm:$0xff] }
 0x128   : > { %1532 = vmatpush.bf16.msrb.mxu1 %v2709_v52 }
 0x129   : > { %v1448_v56 = vpack.c.b16 %v1446_v50, %v1446_v50  ;;  %v613_v9 = vpop.permute.xlu0 %612  ;;  %v2733_v50 = vld [vmem:[%s3208_s20 + $0x190] sm:$0xff] }
 0x12a   : > { %v3381_v63 = vpop.permute.xlu2 %624  ;;  %v645_v40 = vsel %vm644_vm2, %v613_v9, %v615_v32  ;;  %1749 = vmatpush.bf16.msra.mxu3 %v2734_v18  ;;  %v2527_v32 = vld [vmem:[%s3208_s20 + $0x1d8] sm:$0xf] }
 0x12b   : > { %v3383_v20 = vpop.permute.xlu1 %809  ;;  %2431 = vmatmul.msk.bf16.vlgmr.msrb.gmra.mxu3 %vm1298_vm3, %v1448_v56  ;;  %1640 = vmatpush.bf16.msrb.mxu0 %v2722_v51  ;;  %v669_v17 = vadd.f32 %v645_v40, %v3128_v60  ;;  %v2728_v60 = vld [vmem:[%s3208_s20 + $0x168] sm:$0xff]  ;;  %v2528_v9 = vor.u32 %v2742_v42, %v2527_v32  ;;  %v2749_v51 = vld [vmem:[%s3208_s20 + $0x210] sm:$0xff]  ;;  %v2746_v18 = vld [vmem:[%s3208_s20 + $0x1f8] sm:$0xff]  ;;  %v1445_v42 = vunpack.c.l.b16 %v3373_v47 }
 0x12c   : > { %1533 = vmatpush.bf16.msrb.mxu1 %v2708_v6  ;;  %1655 = vmatpush.bf16.msrb.mxu2 %v2728_v60  ;;  %v2732_v6 = vld [vmem:[%s3208_s20 + $0x188] sm:$0xff]  ;;  %v755_v60 = vmul.f32 %v3066_v24, %v3069_v26 }
 0x12d   : > { %v733_v62 = vadd.f32 %v3263_v13, %v669_v17  ;;  %v1743_v4 = vand.u32 %v2528_v9, %v3236_v21  ;;  %v2754_v17 = vld [vmem:[%s3208_s20 + $0x238] sm:$0x30] }
 0x12e   : > { %1750 = vmatpush.bf16.msra.mxu3 %v2733_v50  ;;  %v2745_v50 = vld [vmem:[%s3208_s20 + $0x1f0] sm:$0xff] }
 0x12f   : > { %1641 = vmatpush.bf16.msrb.mxu0 %v2721_v10 }
 0x130   : > { %1534 = vmatpush.bf16.msrb.mxu1 %v2707_v8  ;;  %1656 = vmatpush.bf16.msrb.mxu2 %v2727_v49  ;;  %v2748_v8 = vld [vmem:[%s3208_s20 + $0x208] sm:$0xff] }
 0x131   : > { %v904_v22 = vpop.permute.xlu0 %903 }
 0x132   : > { %v3403_v28 = vpop.permute.xlu2 %630  ;;  %v933_v48 = vsel %vm644_vm2, %v3352_v2, %v904_v22  ;;  %v958_v29 = vadd.f32 %v904_v22, %v854_v12  ;;  %1751 = vmatpush.bf16.msra.mxu3 %v2732_v6  ;;  %v756_v22 = vmul.f32 %v3066_v24, %v3078_v30  ;;  %v2752_v6 = vld [vmem:[%s3208_s20 + $0x228] sm:$0xff] }
 0x133   : > { %v3407_v61 = vpop.permute.xlu1 %815  ;;  %v957_v59 = vadd.f32 %v933_v48, %v853_v55  ;;  %1642 = vmatpush.bf16.msrb.mxu0 %v2720_v38  ;;  %v2576_v55 = vld [vmem:[%s3208_s20 + $0x238] sm:$0xf] }
 0x134   : > { %v974_v2 = vadd.f32 %v958_v29, %v3263_v13  ;;  %1854 = vmatpush.bf16.msra.mxu2 %v2750_v54  ;;  %v2577_v48 = vor.u32 %v2754_v17, %v2576_v55  ;;  %v832_v29 = vsel %vm644_vm2, %v3383_v20, %v3368_v41  ;;  %v860_v38 = vadd.f32 %v3368_v41, %v756_v22  ;;  %v2751_v22 = vld [vmem:[%s3208_s20 + $0x220] sm:$0xff] }
 0x135   : > { %v973_v36 = vadd.f32 %v957_v59, %v3263_v13  ;;  %v2740_v59 = vld [vmem:[%s3208_s20 + $0x1c8] sm:$0xff] }
 0x136   : > { %v990_v37 = vmax.f32 %v734_v31, %v974_v2  ;;  %1752 = vmatpush.bf16.msra.mxu3 %v2731_v7  ;;  %v1852_v31 = vand.u32 %v2577_v48, %v3236_v21 }
 0x137   : > { %v989_v35 = vmax.f32 %v733_v62, %v973_v36  ;;  %1643 = vmatpush.bf16.msrb.mxu0 %v2719_v27  ;;  %v859_v62 = vadd.f32 %v832_v29, %v755_v60 }
 0x138   : > { %v1006_v52 = vmax.f32 %v990_v37, 0.0  ;;  %1855 = vmatpush.bf16.msra.mxu2 %v2749_v51  ;;  %v757_v51 = vmul.f32 %v3031_v14, %v3069_v26 }
 0x139   : > { %v3422_v56 = vpop.permute.xlu0 %813  ;;  %v1005_v53 = vmax.f32 %v989_v35, 0.0  ;;  %v2739_v35 = vld [vmem:[%s3208_s20 + $0x1c0] sm:$0xff] }
 0x13a   : > { %v3424_v57 = vpop.permute.xlu2 %917  ;;  %1871 = vmatpush.bf16.msrb.mxu3 %v1852_v31  ;;  %v833_v47 = vsel %vm644_vm2, %v3422_v56, %v3407_v61 }
 0x13b   : > { %v3426_v13 = vpop.permute.xlu1 %628  ;;  %v1021_v58 = vpack.c.bf16 %v1006_v52, %v1005_v53  ;;  %v2753_v52 = vld [vmem:[%s3208_s20 + $0x230] sm:$0xff] }
 0x13c   : > { %1856 = vmatpush.bf16.msra.mxu2 %v2748_v8 }
 0x13d   : > { %v1222_v19 = vunpack.c.l.b16 %v1021_v58  ;;  %v1223_v1 = vunpack.c.h.b16 %v1021_v58  ;;  %v758_v58 = vmul.f32 %v3031_v14, %v3078_v30  ;;  %v649_v30 = vsel %vm644_vm2, %v3426_v13, %v3403_v28  ;;  %v2761_v13 = vld [vmem:[%s3208_s20 + $0x270] sm:$0xff] }
 0x13e   : > { %1872 = vmatpush.bf16.msrb.mxu3 %v2753_v52  ;;  %v678_v14 = vadd.f32 %v3403_v28, %v3101_v44  ;;  %v2743_v28 = vld [vmem:[%s3208_s20 + $0x1e0] sm:$0xff] }
 0x13f   : > { %v1224_v5 = vpack.c.b16 %v1222_v19, %v1222_v19  ;;  %v1225_v40 = vpack.c.b16 %v1223_v1, %v1223_v1  ;;  %v1447_v1 = vpack.c.b16 %v1445_v42, %v1445_v42 }
 0x140   : > { %1857 = vmatpush.bf16.msra.mxu2 %v2747_v3 }
 0x141   : > { %v627_v10 = vpop.permute.xlu0 %626  ;;  %1317 = vmatmul.bf16.vlgmr.msra.gmra.mxu0 %v1224_v5  ;;  %2333 = vmatmul.msk.bf16.vlgmr.msra.gmra.mxu1 %vm1298_vm3, %v1225_v40  ;;  %v862_v5 = vadd.f32 %v3407_v61, %v758_v58  ;;  %v861_v40 = vadd.f32 %v833_v47, %v757_v51  ;;  %v3503_v58 = vld [vmem:[%s3064_s15 + $0x8] sm:$0xff] }
 0x142   : > { %v3434_v11 = vpop.permute.xlu2 %718  ;;  %1762 = vmatpush.bf16.msra.mxu1 %v1743_v4  ;;  %v648_v2 = vsel %vm644_vm2, %v3381_v63, %v627_v10  ;;  %v676_v36 = vadd.f32 %v627_v10, %v3086_v34  ;;  %v2744_v4 = vld [vmem:[%s3208_s20 + $0x1e8] sm:$0xff]  ;;  %1873 = vmatpush.bf16.msrb.mxu3 %v2752_v6  ;;  %v760_v47 = vmul.f32 %v3503_v58, %v3034_v15 }
 0x143   : > { %v916_v12 = vpop.permute.xlu1 %915  ;;  %v675_v63 = vadd.f32 %v648_v2, %v3084_v33  ;;  %v2762_v33 = vld [vmem:[%s3208_s20 + $0x278] sm:$0xff]  ;;  %v742_v17 = vadd.f32 %v3434_v11, %v678_v14 }
 0x144   : > { %v964_v20 = vadd.f32 %v916_v12, %v860_v38  ;;  %1858 = vmatpush.bf16.msra.mxu2 %v2746_v18 }
 0x146   : > { %1763 = vmatpush.bf16.msra.mxu1 %v2741_v39  ;;  %v677_v39 = vadd.f32 %v649_v30, %v3103_v45  ;;  %1874 = vmatpush.bf16.msrb.mxu3 %v2751_v22  ;;  %v2760_v45 = vld [vmem:[%s3208_s20 + $0x268] sm:$0xff]  ;;  %v2763_v22 = vld [vmem:[%s3208_s20 + $0x280] sm:$0xff] }
 0x148   : > { %1859 = vmatpush.bf16.msra.mxu2 %v2745_v50  ;;  %v741_v48 = vadd.f32 %v3434_v11, %v677_v39 }
 0x149   : > { %v914_v37 = vpop.permute.xlu0 %913 }
 0x14a   : > { %v3454_v41 = vpop.permute.xlu2 %632  ;;  %v936_v32 = vsel %vm644_vm2, %v914_v37, %v916_v12  ;;  %1764 = vmatpush.bf16.msra.mxu1 %v2740_v59 }
 0x14b   : > { %v715_v24 = vpop.permute.xlu1 %714  ;;  %v963_v27 = vadd.f32 %v936_v32, %v859_v62 }
 0x14c   : > { %v740_v49 = vadd.f32 %v715_v24, %v676_v36  ;;  %v980_v34 = vadd.f32 %v964_v20, %v715_v24  ;;  %v739_v54 = vadd.f32 %v715_v24, %v675_v63  ;;  %1860 = vmatpush.bf16.msra.mxu2 %v2744_v4  ;;  %v2766_v20 = vld [vmem:[%s3208_s20 + $0x298] sm:$0x30]  ;;  %v2765_v4 = vld [vmem:[%s3208_s20 + $0x290] sm:$0xff] }
 0x14d   : > { %v979_v53 = vadd.f32 %v963_v27, %v715_v24  ;;  %v2759_v24 = vld [vmem:[%s3208_s20 + $0x260] sm:$0xff] }
 0x14e   : > { %v996_v9 = vmax.f32 %v740_v49, %v980_v34  ;;  %1765 = vmatpush.bf16.msra.mxu1 %v2739_v35  ;;  %v2758_v49 = vld [vmem:[%s3208_s20 + $0x258] sm:$0xff] }
 0x14f   : > { %v995_v19 = vmax.f32 %v739_v54, %v979_v53  ;;  %v2774_v54 = vld [vmem:[%s3208_s20 + $0x2d8] sm:$0xff] }
 0x150   : > { %v1012_v7 = vmax.f32 %v996_v9, 0.0  ;;  %1861 = vmatpush.bf16.msra.mxu2 %v2743_v28  ;;  %2072 = vmatpush.bf16.msra.mxu0 %v2774_v54 }
 0x151   : > { %v1011_v56 = vmax.f32 %v995_v19, 0.0  ;;  %v920_v8 = vpop.permute.xlu0 %919  ;;  %1535 = vmatmul.bf16.vlgmr.msrb.gmra.mxu1 %v1447_v1  ;;  %v2757_v1 = vld [vmem:[%s3208_s20 + $0x250] sm:$0xff] }
 0x152   : > { %v3478_v26 = vpop.permute.xlu2 %923  ;;  %v937_v10 = vsel %vm644_vm2, %v3424_v57, %v920_v8  ;;  %v966_v61 = vadd.f32 %v920_v8, %v862_v5  ;;  %1963 = vmatpush.bf16.msrb.mxu1 %v2762_v33  ;;  %v3508_v33 = vld [vmem:[%s3064_s15] sm:$0xff]  ;;  %v2764_v8 = vld [vmem:[%s3208_s20 + $0x288] sm:$0xff] }
 0x153   : > { %v820_v12 = vpop.permute.xlu1 %819  ;;  %v965_v3 = vadd.f32 %v937_v10, %v861_v40  ;;  %v1024_v55 = vpack.c.bf16 %v1012_v7, %v1011_v56  ;;  %v759_v6 = vmul.f32 %v3508_v33, %v3034_v15  ;;  %v2773_v40 = vld [vmem:[%s3208_s20 + $0x2d0] sm:$0xff]  ;;  %v2756_v7 = vld [vmem:[%s3208_s20 + $0x248] sm:$0xff] }
 0x154   : > { %v982_v44 = vadd.f32 %v966_v61, %v3434_v11  ;;  %v864_v5 = vadd.f32 %v820_v12, %v760_v47  ;;  %2073 = vmatpush.bf16.msra.mxu0 %v2773_v40  ;;  %v2775_v40 = vld [vmem:[%s3208_s20 + $0x2e0] sm:$0xff] }
 0x155   : > { %v981_v57 = vadd.f32 %v965_v3, %v3434_v11  ;;  %v1554_v29 = vunpack.c.l.b16 %v1024_v55  ;;  %v1555_v59 = vunpack.c.h.b16 %v1024_v55  ;;  %v2625_v11 = vld [vmem:[%s3208_s20 + $0x298] sm:$0xf] }
 0x156   : > { %v998_v38 = vmax.f32 %v742_v17, %v982_v44  ;;  %1964 = vmatpush.bf16.msrb.mxu1 %v2761_v13  ;;  %v2626_v42 = vor.u32 %v2766_v20, %v2625_v11  ;;  %v968_v14 = vadd.f32 %v3478_v26, %v864_v5  ;;  %v2772_v13 = vld [vmem:[%s3208_s20 + $0x2c8] sm:$0xff] }
 0x157   : > { %v997_v60 = vmax.f32 %v741_v48, %v981_v57  ;;  %v1556_v18 = vpack.c.b16 %v1554_v29, %v1554_v29  ;;  %v1557_v31 = vpack.c.b16 %v1555_v59, %v1555_v59  ;;  %v2674_v48 = vld [vmem:[%s3208_s20 + $0x2f8] sm:$0xf] }
 0x158   : > { %v1014_v2 = vmax.f32 %v998_v38, 0.0  ;;  %v1961_v34 = vand.u32 %v2626_v42, %v3236_v21  ;;  %2074 = vmatpush.bf16.msra.mxu0 %v2772_v13 }
 0x159   : > { %v1013_v62 = vmax.f32 %v997_v60, 0.0  ;;  %v818_v36 = vpop.permute.xlu0 %817  ;;  %1644 = vmatmul.bf16.vlgmr.msrb.gmra.mxu0 %v1556_v18  ;;  %2480 = vmatmul.msk.bf16.vlgmr.msrb.gmra.mxu2 %vm1298_vm3, %v1557_v31  ;;  %v2770_v18 = vld [vmem:[%s3208_s20 + $0x2b8] sm:$0xff] }
 0x15a   : > { %v3494_v37 = vpop.permute.xlu2 %821  ;;  %1965 = vmatpush.bf16.msrb.mxu1 %v2760_v45  ;;  %v834_v53 = vsel %vm644_vm2, %v818_v36, %v820_v12 }
 0x15b   : > { %v922_v32 = vpop.permute.xlu1 %921  ;;  %v1025_v35 = vpack.c.bf16 %v1014_v2, %v1013_v62  ;;  %v863_v30 = vadd.f32 %v834_v53, %v759_v6 }
 0x15c   : > { %v938_v56 = vsel %vm644_vm2, %v922_v32, %v3478_v26  ;;  %v2755_v26 = vld [vmem:[%s3208_s20 + $0x240] sm:$0xff]  ;;  %v762_v32 = vmul.f32 %v3503_v58, %v3037_v16 }
 0x15d   : > { %v1664_v63 = vunpack.c.h.b16 %v1025_v35  ;;  %v1663_v27 = vunpack.c.l.b16 %v1025_v35  ;;  %v967_v10 = vadd.f32 %v938_v56, %v863_v30  ;;  %v2769_v35 = vld [vmem:[%s3208_s20 + $0x2b0] sm:$0xff]  ;;  %v2767_v56 = vld [vmem:[%s3208_s20 + $0x2a0] sm:$0xff] }
 0x15e   : > { %1966 = vmatpush.bf16.msrb.mxu1 %v2759_v24 }
 0x15f   : > { %v1666_v50 = vpack.c.b16 %v1664_v63, %v1664_v63  ;;  %v1665_v52 = vpack.c.b16 %v1663_v27, %v1663_v27 }
 0x161   : > { %v635_v9 = vpop.permute.xlu0 %634  ;;  %1753 = vmatmul.bf16.vlgmr.msra.gmra.mxu3 %v1665_v52  ;;  %2529 = vmatmul.msk.bf16.vlgmr.msra.gmra.mxu1 %vm1298_vm3, %v1666_v50  ;;  %v2768_v50 = vld [vmem:[%s3208_s20 + $0x2a8] sm:$0xff] }
 0x162   : > { %v3512_v51 = vpop.permute.xlu2 %827  ;;  %1967 = vmatpush.bf16.msrb.mxu1 %v2758_v49  ;;  %1980 = vmatpush.bf16.msra.mxu3 %v1961_v34  ;;  %v650_v15 = vsel %vm644_vm2, %v3454_v41, %v635_v9  ;;  %v680_v12 = vadd.f32 %v635_v9, %v3161_v23  ;;  %v2778_v23 = vld [vmem:[%s3208_s20 + $0x2f8] sm:$0x30]  ;;  %v761_v49 = vmul.f32 %v3508_v33, %v3037_v16  ;;  %v2776_v34 = vld [vmem:[%s3208_s20 + $0x2e8] sm:$0xff] }
 0x163   : > { %v3514_v19 = vpop.permute.xlu1 %465  ;;  %v679_v61 = vadd.f32 %v650_v15, %v3163_v25  ;;  %v2771_v25 = vld [vmem:[%s3208_s20 + $0x2c0] sm:$0xff]  ;;  %v2675_v59 = vor.u32 %v2778_v23, %v2674_v48  ;;  %v530_v23 = vmul.f32 %v3508_v33, %v3218_v0 }
 0x164   : > { %2075 = vmatpush.bf16.msra.mxu0 %v2771_v25  ;;  %v764_v25 = vmul.f32 %v3503_v58, %v3514_v19 }
 0x165   : > { %v2070_v60 = vand.u32 %v2675_v59, %v3236_v21  ;;  %v2777_v21 = vld [vmem:[%s3208_s20 + $0x2f0] sm:$0xff] }
 0x166   : > { %1968 = vmatpush.bf16.msrb.mxu1 %v2757_v1  ;;  %1981 = vmatpush.bf16.msra.mxu3 %v2765_v4 }
 0x167   : > { %2089 = vmatpush.bf16.msrb.mxu2 %v2070_v60 }
 0x168   : > { %2076 = vmatpush.bf16.msra.mxu0 %v2770_v18 }
 0x169   : > { %v723_v39 = vpop.permute.xlu0 %722 }
 0x16a   : > { %v3529_v41 = vpop.permute.xlu2 %640  ;;  %v743_v3 = vadd.f32 %v723_v39, %v679_v61  ;;  %v744_v55 = vadd.f32 %v723_v39, %v680_v12  ;;  %v983_v17 = vadd.f32 %v967_v10, %v723_v39  ;;  %v984_v44 = vadd.f32 %v968_v14, %v723_v39  ;;  %1969 = vmatpush.bf16.msrb.mxu1 %v2756_v7 }
 0x16b   : > { %v3531_v28 = vpop.permute.xlu1 %825  ;;  %1982 = vmatpush.bf16.msra.mxu3 %v2764_v8  ;;  %2090 = vmatpush.bf16.msrb.mxu2 %v2777_v21 }
 0x16c   : > { %v999_v57 = vmax.f32 %v743_v3, %v983_v17  ;;  %v1000_v29 = vmax.f32 %v744_v55, %v984_v44  ;;  %2077 = vmatpush.bf16.msra.mxu0 %v2769_v35  ;;  %v2862_v17 = vld [vmem:[%s3043_s26] sm:$0xff]  ;;  %v836_v48 = vsel %vm644_vm2, %v3531_v28, %v3512_v51  ;;  %v868_v28 = vadd.f32 %v3512_v51, %v764_v25 }
 0x16d   : > { %v482_v44 = vmul.f32 %v2862_v17, %v3514_v19 }
 0x16e   : > { %v1015_v38 = vmax.f32 %v999_v57, 0.0  ;;  %v1016_v45 = vmax.f32 %v1000_v29, 0.0  ;;  %1970 = vmatpush.bf16.msrb.mxu1 %v2755_v26  ;;  %v2863_v26 = vld [vmem:[%s3043_s26 + $0x8] sm:$0xff]  ;;  %v763_v57 = vmul.f32 %v3508_v33, %v3514_v19  ;;  %v531_v29 = vmul.f32 %v3503_v58, %v3218_v0 }
 0x16f   : > { %1983 = vmatpush.bf16.msra.mxu3 %v2763_v22  ;;  %2091 = vmatpush.bf16.msrb.mxu2 %v2776_v34  ;;  %v483_v22 = vmul.f32 %v2863_v26, %v3514_v19  ;;  %v546_v18 = vadd.f32 %v530_v23, %v482_v44 }
 0x170   : > { %v1026_v31 = vpack.c.bf16 %v1016_v45, %v1015_v38  ;;  %2078 = vmatpush.bf16.msra.mxu0 %v2768_v50  ;;  %v867_v60 = vadd.f32 %v836_v48, %v763_v57 }
 0x171   : > { %v824_v2 = vpop.permute.xlu0 %823 }
 0x172   : > { %v928_v62 = vpop.permute.xlu2 %927  ;;  %v1772_v11 = vunpack.c.l.b16 %v1026_v31  ;;  %v1773_v20 = vunpack.c.h.b16 %v1026_v31  ;;  %v866_v63 = vadd.f32 %v824_v2, %v762_v32  ;;  %v835_v27 = vsel %vm644_vm2, %v3494_v37, %v824_v2 }
 0x173   : > { %v639_v36 = vpop.permute.xlu1 %638  ;;  %v865_v9 = vadd.f32 %v835_v27, %v761_v49  ;;  %2092 = vmatpush.bf16.msrb.mxu2 %v2775_v40  ;;  %v547_v31 = vadd.f32 %v531_v29, %v483_v22 }
 0x174   : > { %v1774_v24 = vpack.c.b16 %v1772_v11, %v1772_v11  ;;  %v1775_v42 = vpack.c.b16 %v1773_v20, %v1773_v20  ;;  %v970_v52 = vadd.f32 %v928_v62, %v866_v63  ;;  %v682_v54 = vadd.f32 %v639_v36, %v3192_v43  ;;  %2079 = vmatpush.bf16.msra.mxu0 %v2767_v56 }
 0x176   : > { %1862 = vmatmul.bf16.vlgmr.msra.gmra.mxu2 %v1774_v24  ;;  %2578 = vmatmul.msk.bf16.vlgmr.msrb.gmra.mxu3 %vm1298_vm3, %v1775_v42 }
 0x179   : > { %v637_v53 = vpop.permute.xlu0 %636 }
 0x17a   : > { %v727_v47 = vpop.permute.xlu2 %726  ;;  %v651_v6 = vsel %vm644_vm2, %v637_v53, %v639_v36 }
 0x17b   : > { %v926_v1 = vpop.permute.xlu1 %925  ;;  %v746_v4 = vadd.f32 %v727_v47, %v682_v54  ;;  %v986_v37 = vadd.f32 %v970_v52, %v727_v47  ;;  %v681_v5 = vadd.f32 %v651_v6, %v3194_v46 }
 0x17c   : > { %v939_v30 = vsel %vm644_vm2, %v926_v1, %v928_v62 }
 0x17d   : > { %v969_v16 = vadd.f32 %v939_v30, %v865_v9  ;;  %v1002_v15 = vmax.f32 %v746_v4, %v986_v37  ;;  %v745_v43 = vadd.f32 %v727_v47, %v681_v5 }
 0x17f   : > { %v985_v7 = vadd.f32 %v969_v16, %v727_v47  ;;  %v1018_v10 = vmax.f32 %v1002_v15, 0.0 }
 0x181   : > { %v1001_v8 = vmax.f32 %v745_v43, %v985_v7  ;;  %v643_v14 = vpop.permute.xlu0 %642 }
 0x182   : > { %v652_v38 = vsel %vm644_vm2, %v3529_v41, %v643_v14  ;;  %v684_v62 = vadd.f32 %v643_v14, %v547_v31 }
 0x183   : > { %v1017_v61 = vmax.f32 %v1001_v8, 0.0  ;;  %v932_v59 = vpop.permute.xlu1 %931  ;;  %v683_v2 = vadd.f32 %v652_v38, %v546_v18 }
 0x184   : > { %v972_v36 = vadd.f32 %v932_v59, %v868_v28 }
 0x185   : > { %v1027_v12 = vpack.c.bf16 %v1018_v10, %v1017_v61 }
 0x187   : > { %v1882_v46 = vunpack.c.h.b16 %v1027_v12  ;;  %v1881_v13 = vunpack.c.l.b16 %v1027_v12 }
 0x189   : > { %v1884_v39 = vpack.c.b16 %v1882_v46, %v1882_v46  ;;  %v1883_v3 = vpack.c.b16 %v1881_v13, %v1881_v13  ;;  %v930_v55 = vpop.permute.xlu0 %929 }
 0x18a   : > { %v940_v45 = vsel %vm644_vm2, %v930_v55, %v932_v59 }
 0x18b   : > { %1971 = vmatmul.bf16.vlgmr.msrb.gmra.mxu1 %v1883_v3  ;;  %2627 = vmatmul.msk.bf16.vlgmr.msra.gmra.mxu3 %vm1298_vm3, %v1884_v39  ;;  %v971_v11 = vadd.f32 %v940_v45, %v867_v60 }
 0x191   : > { %v731_v20 = vpop.permute.xlu0 %730 }
 0x192   : > { %v747_v33 = vadd.f32 %v731_v20, %v683_v2  ;;  %v748_v19 = vadd.f32 %v731_v20, %v684_v62  ;;  %v987_v32 = vadd.f32 %v971_v11, %v731_v20  ;;  %v988_v0 = vadd.f32 %v972_v36, %v731_v20 }
 0x194   : > { %v1003_v58 = vmax.f32 %v747_v33, %v987_v32  ;;  %v1004_v24 = vmax.f32 %v748_v19, %v988_v0 }
 0x196   : > { %v1019_v42 = vmax.f32 %v1003_v58, 0.0  ;;  %v1020_v41 = vmax.f32 %v1004_v24, 0.0 }
 0x198   : > { %v1028_v21 = vpack.c.bf16 %v1020_v41, %v1019_v42 }
 0x19a   : > { %v1991_v35 = vunpack.c.h.b16 %v1028_v21  ;;  %v1990_v63 = vunpack.c.l.b16 %v1028_v21 }
 0x19c   : > { %v1993_v27 = vpack.c.b16 %v1991_v35, %v1991_v35  ;;  %v1427_v49 = vpop.f32.mrf.mxu2  ;;  %v1440_v34 = vpop.f32.mrf.mxu3  ;;  %v1992_v51 = vpack.c.b16 %v1990_v63, %v1990_v63 }
 0x19d   : > { %v1441_v50 = vadd.f32 %v1440_v34, %v1427_v49 }
 0x19e   : > { %2080 = vmatmul.bf16.vlgmr.msra.gmra.mxu0 %v1992_v51  ;;  %2676 = vmatmul.msk.bf16.vlgmr.msrb.gmra.mxu2 %vm1298_vm3, %v1993_v27 }
 0x1a4   : > { %v1429_v52 = vpop.f32.mrf.mxu2  ;;  %v1442_v54 = vpop.f32.mrf.mxu3 }
 0x1ae   : > { %v1549_v53 = vpop.f32.mrf.mxu3 }
 0x1b6   : > { %v1551_v9 = vpop.f32.mrf.mxu3 }
 0x1be   : > { %v1318_v47 = vpop.f32.mrf.mxu0  ;;  %v1331_v6 = vpop.f32.mrf.mxu1 }
 0x1bf   : > { %v1332_v1 = vadd.f32 %v1331_v6, %v1318_v47 }
 0x1c1   : > { %v2098_v4 = vadd.f32 %v1441_v50, %v1332_v1 }
 0x1c6   : > { %v1320_v37 = vpop.f32.mrf.mxu0  ;;  %v1333_v5 = vpop.f32.mrf.mxu1 }
 0x1ce   : > { %v1536_v30 = vpop.f32.mrf.mxu1 }
 0x1cf   : > { %v1550_v16 = vadd.f32 %v1549_v53, %v1536_v30 }
 0x1d1   : > { %v2099_v40 = vadd.f32 %v2098_v4, %v1550_v16 }
 0x1d6   : > { %v1538_v56 = vpop.f32.mrf.mxu1  ;;  %v1645_v15 = vpop.f32.mrf.mxu0 }
 0x1dc   : > { %v1658_v43 = vpop.f32.mrf.mxu2 }
 0x1dd   : > { %v1659_v7 = vadd.f32 %v1658_v43, %v1645_v15 }
 0x1de   : > { %v1647_v8 = vpop.f32.mrf.mxu0  ;;  %v1767_v14 = vpop.f32.mrf.mxu1 }
 0x1df   : > { %v2100_v10 = vadd.f32 %v2099_v40, %v1659_v7 }
 0x1e4   : > { %v1660_v61 = vpop.f32.mrf.mxu2  ;;  %v1754_v12 = vpop.f32.mrf.mxu3 }
 0x1e5   : > { %v1768_v46 = vadd.f32 %v1767_v14, %v1754_v12 }
 0x1e6   : > { %v1769_v13 = vpop.f32.mrf.mxu1 }
 0x1e7   : > { %v2101_v39 = vadd.f32 %v2100_v10, %v1768_v46 }
 0x1ec   : > { %v1756_v3 = vpop.f32.mrf.mxu3 }
 0x1f9   : > { %v1863_v55 = vpop.f32.mrf.mxu2  ;;  %v1876_v17 = vpop.f32.mrf.mxu3 }
 0x1fa   : > { %v1877_v29 = vadd.f32 %v1876_v17, %v1863_v55 }
 0x1fc   : > { %v2102_v38 = vadd.f32 %v2101_v39, %v1877_v29 }
 0x201   : > { %v1865_v44 = vpop.f32.mrf.mxu2  ;;  %v1878_v26 = vpop.f32.mrf.mxu3 }
 0x208   : > { %v1972_v22 = vpop.f32.mrf.mxu1 }
 0x20e   : > { %v1985_v25 = vpop.f32.mrf.mxu3 }
 0x20f   : > { %v1986_v59 = vadd.f32 %v1985_v25, %v1972_v22 }
 0x210   : > { %v1974_v48 = vpop.f32.mrf.mxu1 }
 0x211   : > { %v2103_v60 = vadd.f32 %v2102_v38, %v1986_v59 }
 0x216   : > { %v1987_v23 = vpop.f32.mrf.mxu3 }
 0x21b   : > { %v2081_v57 = vpop.f32.mrf.mxu0 }
 0x221   : > { %v2094_v45 = vpop.f32.mrf.mxu2 }
 0x222   : > { %v2095_v18 = vadd.f32 %v2094_v45, %v2081_v57 }
 0x223   : > { %v2083_v31 = vpop.f32.mrf.mxu0 }
 0x224   : > { %v2104_v28 = vadd.f32 %v2103_v60, %v2095_v18 }
 0x225   : > { %2108 = sbr.rel (%p2677_p7) target bundleno = 556 (0x22c), region = 56 }
 0x229   : > { %v2096_v2 = vpop.f32.mrf.mxu2 }
 0x22a   : > { %v2911_v62 = vmov 0.0  }
 0x22b   : > { %2109 = vst [vmem:[#allocation2] sm:$0xff] %v2911_v62 }
 0x22c PF: > { %p2678_p8 = scmp.ne.s32.totalorder %s2888_s27, 7 }
 0x231   : > { %2116 = sbr.rel (%p2678_p8) target bundleno = 727 (0x2d7), region = 60 }
 0x232   : > { %v2110_v36 = vld [vmem:[#allocation2] sm:$0xff] }
 0x233   : > { %v2111_v11 = vadd.f32 %v2110_v36, %v2104_v28 }
 0x235   : > { %2112 = vst [vmem:[#allocation2] sm:$0xff] %v2111_v11 }
 0x236   : > { %v2139_v20 = vld [vmem:[%s3656_s6 + $0x78] sm:$0xff]  ;;  %v2138_v33 = vld [vmem:[%s3656_s6 + $0x70] sm:$0xff]  ;;  %v2137_v19 = vld [vmem:[%s3656_s6 + $0x68] sm:$0xff] }
 0x237   : > { %2144 = vmatpush.msra.mxu0 %v2139_v20  ;;  %v2136_v32 = vld [vmem:[%s3656_s6 + $0x60] sm:$0xff]  ;;  %v2135_v0 = vld [vmem:[%s3656_s6 + $0x58] sm:$0xff]  ;;  %v2134_v58 = vld [vmem:[%s3656_s6 + $0x50] sm:$0xff] }
 0x238   : > { %v2133_v24 = vld [vmem:[%s3656_s6 + $0x48] sm:$0xff]  ;;  %v2132_v42 = vld [vmem:[%s3656_s6 + $0x40] sm:$0xff]  ;;  %v2131_v41 = vld [vmem:[%s3656_s6 + $0x38] sm:$0xff] }
 0x239   : > { %2145 = vmatpush.msra.mxu0 %v2138_v33  ;;  %v2130_v21 = vld [vmem:[%s3656_s6 + $0x30] sm:$0xff]  ;;  %v2129_v35 = vld [vmem:[%s3656_s6 + $0x28] sm:$0xff]  ;;  %v2128_v63 = vld [vmem:[%s3656_s6 + $0x20] sm:$0xff] }
 0x23a   : > { %v2864_v27 = vld [vmem:[%s3655_s5] ss:$0 sm:$0xff]  ;;  %v2127_v34 = vld [vmem:[%s3656_s6 + $0x18] sm:$0xff]  ;;  %v2126_v51 = vld [vmem:[%s3656_s6 + $0x10] sm:$0xff] }
 0x23b   : > { %2146 = vmatpush.msra.mxu0 %v2137_v19  ;;  %v2125_v52 = vld [vmem:[%s3656_s6 + $0x8] sm:$0xff]  ;;  %v2124_v54 = vld [vmem:[%s3656_s6] sm:$0xff] }
 0x23c   : > { %v2117_v49 = vld [vmem:[#allocation2] sm:$0xff] }
 0x23d   : > { %2147 = vmatpush.msra.mxu0 %v2136_v32  ;;  %v2122_v50 = vadd.f32 %v2864_v27, %v2117_v49  ;;  %v2865_v9 = vld [vmem:[%s3657_s7] ss:$0 sm:$0xff] }
 0x23f   : > { %2148 = vmatpush.msra.mxu0 %v2135_v0  ;;  %v2123_v53 = vmax.f32 %v2122_v50, 0.0 }
 0x241   : > { %2149 = vmatpush.msra.mxu0 %v2134_v58 }
 0x243   : > { %2150 = vmatpush.msra.mxu0 %v2133_v24 }
 0x245   : > { %2151 = vmatpush.msra.mxu0 %v2132_v42 }
 0x247   : > { %2152 = vmatpush.msra.mxu0 %v2131_v41 }
 0x249   : > { %2153 = vmatpush.msra.mxu0 %v2130_v21 }
 0x24b   : > { %2154 = vmatpush.msra.mxu0 %v2129_v35 }
 0x24d   : > { %2155 = vmatpush.msra.mxu0 %v2128_v63 }
 0x24f   : > { %2156 = vmatpush.msra.mxu0 %v2127_v34 }
 0x251   : > { %2157 = vmatpush.msra.mxu0 %v2126_v51 }
 0x253   : > { %2158 = vmatpush.msra.mxu0 %v2125_v52 }
 0x255   : > { %2159 = vmatpush.msra.mxu0 %v2124_v54 }
 0x256   : > { %2160 = vmatmul.f32.vlgmr.msra.gmra.mxu0 %v2123_v53 }
 0x2d3   : > { %v2161_v47 = vpop.f32.mrf.mxu0 }
 0x2d4   : > { %v2162_v6 = vadd.f32 %v2865_v9, %v2161_v47 }
 0x2d6   : > { %2164 = vst [vmem:[%s3009_s19] sm:$0xff] %v2162_v6 }
 0x2d7 PF: > { %s18_s9 = sadd.s32 1, %s2904_s9   ;;  %s3659_s27 = smov %s2896_s29 }
 0x2d8   : > { %p15_p9 = scmp.ge.s32.totalorder %s18_s9, 18   ;;  %s3660_s28 = smov %s2900_s30 }
 0x2d9   : > { %s3661_s29 = smov %s3664_s10  ;;  %s3662_s30 = smov %s3668_s11 }
 0x2da   :  { %17 = sbr.rel (!%p15_p9) target bundleno = 3 (0x3), region = 102 }

</bundles_post_ra>
